<compile_context>
chip_gen: v7x
topology: tpu7x:2x2x1
jax: 0.10.0
libtpu: 0.0.40
codegen_flags: <defaults>
</compile_context>

<pallas_src>
import functools
import math

import jax
import jax.numpy as jnp
from jax.experimental import pallas as pl
from jax.experimental.pallas import tpu as pltpu

D_MODEL = 32
HEADS = 4
D_FF = 64
EPS = 1e-6
SQRT_2_OVER_PI = math.sqrt(2.0 / math.pi)
NEG_INF = -1e18


def _layer_norm(x, gamma, beta):
    # torch.nn.LayerNorm with eps=1e-6 (biased variance over last dim)
    mean = jnp.mean(x, axis=-1, keepdims=True)
    var = jnp.mean((x - mean) ** 2, axis=-1, keepdims=True)
    return (x - mean) * jax.lax.rsqrt(var + EPS) * gamma + beta


def _gelu(x):
    # PreSumm's tanh-approximation GELU
    return 0.5 * x * (1.0 + jnp.tanh(SQRT_2_OVER_PI * (x + 0.044715 * x * x * x)))


def encoder_layer_kernel(
    x_ref, maskb_ref,                       # (Bblk, L, D), (Bblk, 1, L) additive bias
    wqkv_ref, bqkv_ref,                     # (D, 3D), (1, 3D) fused Q|K|V projection
    wo_ref, bo_ref,                         # (D, D), (1, D)
    ln_ref,                                 # (4, D) rows = [g1, b1, g2, b2]
    w1_ref, bf1_ref, w2_ref, bf2_ref,       # feed-forward
    o_ref,                                  # (Bblk, L, D)
    *, heads, apply_pre_ln,
):
    Bblk, L, D = x_ref.shape
    H = heads
    dh = D // H
    scale = 1.0 / math.sqrt(dh)

    x = x_ref[...].astype(jnp.float32).reshape(Bblk * L, D)      # (Bblk*L, D)

    # --- optional pre-LayerNorm (iter != 0), specialized at trace time -----------
    if apply_pre_ln:
        xin = _layer_norm(x, ln_ref[0:1, :], ln_ref[1:2, :])
    else:
        xin = x

    # --- fused Q/K/V projection: one (Bblk*L, D) @ (D, 3D) MXU call --------------
    qkv = jnp.dot(xin, wqkv_ref[...], preferred_element_type=jnp.float32) + bqkv_ref[...]

    # --- multi-head self-attention: all heads batched per batch row --------------
    # TODO(synk): at realistic L this should become flash-style tiling instead of
    # materializing the full (H, L, L) score block (relevant for v7x's 64 MiB VMEM).
    ctx_rows = []
    for b in range(Bblk):                           # tiny static loop (Bblk in {1, 2})
        rows = qkv[b * L:(b + 1) * L]               # (L, 3D)
        qh = jnp.stack([rows[:, h * dh:(h + 1) * dh] for h in range(H)], axis=0) * scale
        kh = jnp.stack([rows[:, D + h * dh:D + (h + 1) * dh] for h in range(H)], axis=0)
        vh = jnp.stack([rows[:, 2 * D + h * dh:2 * D + (h + 1) * dh] for h in range(H)], axis=0)

        scores = jnp.einsum("hqd,hkd->hqk", qh, kh,
                            preferred_element_type=jnp.float32)   # (H, L, L)
        scores = scores + maskb_ref[b]              # additive -1e18 key bias (broadcast)
        scores = scores - jnp.max(scores, axis=-1, keepdims=True)
        p = jnp.exp(scores)
        p = p * pl.reciprocal(jnp.sum(p, axis=-1, keepdims=True), approx=True)
        ctx = jnp.einsum("hqk,hkd->hqd", p, vh,
                         preferred_element_type=jnp.float32)      # (H, L, dh)
        # heads back onto the feature axis; stays in registers (no VMEM scratch)
        ctx_rows.append(jnp.concatenate([ctx[h] for h in range(H)], axis=-1))  # (L, D)

    ctx_all = ctx_rows[0] if Bblk == 1 else jnp.concatenate(ctx_rows, axis=0)  # (Bblk*L, D)

    attn_out = jnp.dot(ctx_all, wo_ref[...], preferred_element_type=jnp.float32) + bo_ref[...]
    # TODO(synk): nn.Dropout layers are identity (eval-mode semantics).
    out = attn_out + x                              # residual #1

    # --- position-wise feed-forward ------------------------------------------------
    ln2 = _layer_norm(out, ln_ref[2:3, :], ln_ref[3:4, :])
    inter = _gelu(jnp.dot(ln2, w1_ref[...], preferred_element_type=jnp.float32) + bf1_ref[...])
    ff = jnp.dot(inter, w2_ref[...], preferred_element_type=jnp.float32) + bf2_ref[...]
    o_ref[...] = (ff + out).reshape(Bblk, L, D).astype(o_ref.dtype)   # residual #2


def _num_batch_blocks(B):
    """One grid step on single-TC chips; >=2 parallel steps on v7x (2 TCs/chip)."""
    try:
        kind = jax.devices()[0].device_kind.lower()
    except Exception:
        kind = ""
    want = 2 if "v7" in kind else 1
    nb = min(B, max(want, 1))
    while nb > 1 and B % nb:
        nb -= 1
    return max(nb, 1)


def transformer_encoder_layer(params, it, inputs, mask):
    """inputs: (B, L, D) f32; mask: (B, L) bool/float, True => padding."""
    B, L, D = inputs.shape

    # Pack weights once in the wrapper: fused QKV + stacked LayerNorm params.
    wqkv = jnp.concatenate([params["wq"], params["wk"], params["wv"]], axis=1)   # (D, 3D)
    bqkv = jnp.concatenate([params["bq"], params["bk"], params["bv"]], axis=1)   # (1, 3D)
    lnp = jnp.concatenate([params["g1"], params["b1"], params["g2"], params["b2"]], axis=0)  # (4, D)
    weights = [wqkv, bqkv, params["wo"], params["bo"], lnp,
               params["w1"], params["bf1"], params["w2"], params["bf2"]]

    # Additive attention bias (True => -1e18), computed once per call.
    mask_bias = (mask.astype(jnp.float32) * NEG_INF).reshape(B, 1, L)

    nb = _num_batch_blocks(B)
    bblk = B // nb

    kernel = functools.partial(encoder_layer_kernel, heads=HEADS, apply_pre_ln=(it != 0))

    in_specs = [
        pl.BlockSpec((bblk, L, D), lambda i: (i, 0, 0)),     # x
        pl.BlockSpec((bblk, 1, L), lambda i: (i, 0, 0)),     # mask bias
    ] + [pl.BlockSpec(w.shape, lambda i: (0, 0)) for w in weights]

    grid_spec = pltpu.PrefetchScalarGridSpec(
        num_scalar_prefetch=0,
        grid=(nb,),
        in_specs=in_specs,
        out_specs=pl.BlockSpec((bblk, L, D), lambda i: (i, 0, 0)),
    )

    return pl.pallas_call(
        kernel,
        out_shape=jax.ShapeDtypeStruct((B, L, D), jnp.float32),
        grid_spec=grid_spec,
        compiler_params=pltpu.CompilerParams(dimension_semantics=("parallel",)),
    )(inputs, mask_bias, *weights)


# ------------------------------- pure-JAX reference -------------------------------
def reference(it, x, mask, p):
    B, L, D = x.shape
    H, dh = HEADS, D // HEADS

    def ln(y, g, b):
        m = y.mean(-1, keepdims=True)
        v = ((y - m) ** 2).mean(-1, keepdims=True)
        return (y - m) / jnp.sqrt(v + EPS) * g + b

    xin = ln(x, p["g1"], p["b1"]) if it != 0 else x
    q = xin @ p["wq"] + p["bq"]
    k = xin @ p["wk"] + p["bk"]
    v = xin @ p["wv"] + p["bv"]
    qh = q.reshape(B, L, H, dh).transpose(0, 2, 1, 3)
    kh = k.reshape(B, L, H, dh).transpose(0, 2, 1, 3)
    vh = v.reshape(B, L, H, dh).transpose(0, 2, 1, 3)
    scores = jnp.einsum("bhqd,bhkd->bhqk", qh, kh) / math.sqrt(dh)
    scores = jnp.where(mask[:, None, None, :], NEG_INF, scores)
    attn = jax.nn.softmax(scores, axis=-1)
    ctx = jnp.einsum("bhqk,bhkd->bhqd", attn, vh).transpose(0, 2, 1, 3).reshape(B, L, D)
    out = ctx @ p["wo"] + p["bo"] + x
    ln2 = ln(out, p["g2"], p["b2"])
    inter = _gelu(ln2 @ p["w1"] + p["bf1"])
    return inter @ p["w2"] + p["bf2"] + out


def init_params(key, d_model, d_ff):
    ks = jax.random.split(key, 12)
    s = 0.02
    return {
        "wq": jax.random.normal(ks[0], (d_model, d_model), jnp.float32) * s,
        "bq": jax.random.normal(ks[1], (1, d_model), jnp.float32) * s,
        "wk": jax.random.normal(ks[2], (d_model, d_model), jnp.float32) * s,
        "bk": jax.random.normal(ks[3], (1, d_model), jnp.float32) * s,
        "wv": jax.random.normal(ks[4], (d_model, d_model), jnp.float32) * s,
        "bv": jax.random.normal(ks[5], (1, d_model), jnp.float32) * s,
        "wo": jax.random.normal(ks[6], (d_model, d_model), jnp.float32) * s,
        "bo": jax.random.normal(ks[7], (1, d_model), jnp.float32) * s,
        "g1": jnp.ones((1, d_model), jnp.float32),
        "b1": jnp.zeros((1, d_model), jnp.float32),
        "g2": jnp.ones((1, d_model), jnp.float32),
        "b2": jnp.zeros((1, d_model), jnp.float32),
        "w1": jax.random.normal(ks[8], (d_model, d_ff), jnp.float32) * s,
        "bf1": jax.random.normal(ks[9], (1, d_ff), jnp.float32) * s,
        "w2": jax.random.normal(ks[10], (d_ff, d_model), jnp.float32) * s,
        "bf2": jax.random.normal(ks[11], (1, d_model), jnp.float32) * s,
    }


if __name__ == "__main__":
    B, L = 2, 8
    key = jax.random.PRNGKey(0)
    k_x, k_p = jax.random.split(key)

    x = jax.random.normal(k_x, (B, L, D_MODEL), jnp.float32)
    lengths = jnp.array([8, 5], dtype=jnp.int32)
    mask = jnp.arange(L)[None, :] >= lengths[:, None]        # (B, L) True => padding
    params = init_params(k_p, D_MODEL, D_FF)

    it = 1                                                   # iter != 0 => pre-LayerNorm applied
    out = transformer_encoder_layer(params, it, x, mask)
    out = jax.block_until_ready(out)

    ref = reference(it, x, mask, params)
    assert out.shape == (B, L, D_MODEL)
    assert jnp.allclose(out, ref, atol=5e-3, rtol=5e-3), float(jnp.max(jnp.abs(out - ref)))

    # also exercise the iter == 0 (no pre-LayerNorm) specialization
    out0 = jax.block_until_ready(transformer_encoder_layer(params, 0, x, mask))
    ref0 = reference(0, x, mask, params)
    assert jnp.allclose(out0, ref0, atol=5e-3, rtol=5e-3), float(jnp.max(jnp.abs(out0 - ref0)))

    print("KERNEL_OK")
</pallas_src>

<mosaic_0001>
module attributes {stable_mosaic.version = 11 : i64} {
  func.func @encoder_layer_kernel(%arg0: i32, %arg1: memref<2x8x32xf32, #tpu.memory_space<vmem>>, %arg2: memref<2x1x8xf32, #tpu.memory_space<vmem>>, %arg3: memref<32x96xf32, #tpu.memory_space<vmem>>, %arg4: memref<1x96xf32, #tpu.memory_space<vmem>>, %arg5: memref<32x32xf32, #tpu.memory_space<vmem>>, %arg6: memref<1x32xf32, #tpu.memory_space<vmem>>, %arg7: memref<4x32xf32, #tpu.memory_space<vmem>>, %arg8: memref<32x64xf32, #tpu.memory_space<vmem>>, %arg9: memref<1x64xf32, #tpu.memory_space<vmem>>, %arg10: memref<64x32xf32, #tpu.memory_space<vmem>>, %arg11: memref<1x32xf32, #tpu.memory_space<vmem>>, %arg12: memref<2x8x32xf32, #tpu.memory_space<vmem>>) attributes {dimension_semantics = [#tpu.dimension_semantics<parallel>], iteration_bounds = array<i64: 1>, scalar_prefetch = 0 : i64, scratch_operands = 0 : i64, tpu.core_type = #tpu.core_type<tc>, window_params = [{transform_indices = @transform_0, window_bounds = array<i64: 2, 8, 32>}, {transform_indices = @transform_1, window_bounds = array<i64: 2, 1, 8>}, {pipeline_mode = #tpu.pipeline_mode<synchronous>, transform_indices = @transform_2, window_bounds = array<i64: 32, 96>}, {pipeline_mode = #tpu.pipeline_mode<synchronous>, transform_indices = @transform_3, window_bounds = array<i64: 1, 96>}, {pipeline_mode = #tpu.pipeline_mode<synchronous>, transform_indices = @transform_4, window_bounds = array<i64: 32, 32>}, {pipeline_mode = #tpu.pipeline_mode<synchronous>, transform_indices = @transform_5, window_bounds = array<i64: 1, 32>}, {pipeline_mode = #tpu.pipeline_mode<synchronous>, transform_indices = @transform_6, window_bounds = array<i64: 4, 32>}, {pipeline_mode = #tpu.pipeline_mode<synchronous>, transform_indices = @transform_7, window_bounds = array<i64: 32, 64>}, {pipeline_mode = #tpu.pipeline_mode<synchronous>, transform_indices = @transform_8, window_bounds = array<i64: 1, 64>}, {pipeline_mode = #tpu.pipeline_mode<synchronous>, transform_indices = @transform_9, window_bounds = array<i64: 64, 32>}, {pipeline_mode = #tpu.pipeline_mode<synchronous>, transform_indices = @transform_10, window_bounds = array<i64: 1, 32>}, {transform_indices = @transform_11, window_bounds = array<i64: 2, 8, 32>}]} {
    %c0 = arith.constant 0 : index
    %c0_0 = arith.constant 0 : index
    %c0_1 = arith.constant 0 : index
    %0 = vector.load %arg1[%c0, %c0_0, %c0_1] : memref<2x8x32xf32, #tpu.memory_space<vmem>>, vector<2x8x32xf32>
    %1 = vector.shape_cast %0 : vector<2x8x32xf32> to vector<16x32xf32>
    %c0_2 = arith.constant 0 : index
    %c0_3 = arith.constant 0 : index
    %2 = vector.load %arg7[%c0_2, %c0_3] : memref<4x32xf32, #tpu.memory_space<vmem>>, vector<1x32xf32>
    %c1 = arith.constant 1 : index
    %c0_4 = arith.constant 0 : index
    %3 = vector.load %arg7[%c1, %c0_4] : memref<4x32xf32, #tpu.memory_space<vmem>>, vector<1x32xf32>
    %cst = arith.constant dense<0.000000e+00> : vector<16xf32>
    %4 = vector.multi_reduction <add>, %1, %cst [1] : vector<16x32xf32> to vector<16xf32>
    %5 = vector.shape_cast %4 : vector<16xf32> to vector<16x1xf32>
    %cst_5 = arith.constant 3.200000e+01 : f32
    %6 = vector.broadcast %cst_5 : f32 to vector<16x1xf32>
    %7 = arith.divf %5, %6 : vector<16x1xf32>
    %8 = vector.broadcast %7 : vector<16x1xf32> to vector<16x32xf32>
    %9 = arith.subf %1, %8 : vector<16x32xf32>
    %10 = arith.mulf %9, %9 : vector<16x32xf32>
    %cst_6 = arith.constant dense<0.000000e+00> : vector<16xf32>
    %11 = vector.multi_reduction <add>, %10, %cst_6 [1] : vector<16x32xf32> to vector<16xf32>
    %12 = vector.shape_cast %11 : vector<16xf32> to vector<16x1xf32>
    %cst_7 = arith.constant 3.200000e+01 : f32
    %13 = vector.broadcast %cst_7 : f32 to vector<16x1xf32>
    %14 = arith.divf %12, %13 : vector<16x1xf32>
    %15 = vector.broadcast %7 : vector<16x1xf32> to vector<16x32xf32>
    %16 = arith.subf %1, %15 : vector<16x32xf32>
    %cst_8 = arith.constant 9.99999997E-7 : f32
    %17 = vector.broadcast %cst_8 : f32 to vector<16x1xf32>
    %18 = arith.addf %14, %17 : vector<16x1xf32>
    %19 = math.rsqrt %18 : vector<16x1xf32>
    %20 = vector.broadcast %19 : vector<16x1xf32> to vector<16x32xf32>
    %21 = arith.mulf %16, %20 : vector<16x32xf32>
    %22 = vector.broadcast %2 : vector<1x32xf32> to vector<16x32xf32>
    %23 = arith.mulf %21, %22 : vector<16x32xf32>
    %24 = vector.broadcast %3 : vector<1x32xf32> to vector<16x32xf32>
    %25 = arith.addf %23, %24 : vector<16x32xf32>
    %c0_9 = arith.constant 0 : index
    %c0_10 = arith.constant 0 : index
    %26 = vector.load %arg3[%c0_9, %c0_10] : memref<32x96xf32, #tpu.memory_space<vmem>>, vector<32x96xf32>
    %cst_11 = arith.constant dense<0.000000e+00> : vector<16x96xf32>
    %27 = tpu.matmul %25, %26, %cst_11 {dimension_numbers = #tpu.dot_dimension_numbers<[1], [0], [0], [1], [0, 0, 1, 1], [], []>} : vector<16x32xf32>, vector<32x96xf32>, vector<16x96xf32> -> vector<16x96xf32>
    %c0_12 = arith.constant 0 : index
    %c0_13 = arith.constant 0 : index
    %28 = vector.load %arg4[%c0_12, %c0_13] : memref<1x96xf32, #tpu.memory_space<vmem>>, vector<1x96xf32>
    %29 = vector.broadcast %28 : vector<1x96xf32> to vector<16x96xf32>
    %30 = arith.addf %27, %29 : vector<16x96xf32>
    %31 = vector.extract_strided_slice %30 {offsets = [0, 0], sizes = [8, 96], strides = [1, 1]} : vector<16x96xf32> to vector<8x96xf32>
    %32 = vector.extract_strided_slice %31 {offsets = [0, 0], sizes = [8, 8], strides = [1, 1]} : vector<8x96xf32> to vector<8x8xf32>
    %33 = vector.extract_strided_slice %31 {offsets = [0, 8], sizes = [8, 8], strides = [1, 1]} : vector<8x96xf32> to vector<8x8xf32>
    %34 = vector.extract_strided_slice %31 {offsets = [0, 16], sizes = [8, 8], strides = [1, 1]} : vector<8x96xf32> to vector<8x8xf32>
    %35 = vector.extract_strided_slice %31 {offsets = [0, 24], sizes = [8, 8], strides = [1, 1]} : vector<8x96xf32> to vector<8x8xf32>
    %36 = vector.shape_cast %32 : vector<8x8xf32> to vector<1x8x8xf32>
    %37 = vector.shape_cast %33 : vector<8x8xf32> to vector<1x8x8xf32>
    %38 = vector.shape_cast %34 : vector<8x8xf32> to vector<1x8x8xf32>
    %39 = vector.shape_cast %35 : vector<8x8xf32> to vector<1x8x8xf32>
    %40 = tpu.concatenate %36, %37, %38, %39 in 0 : vector<1x8x8xf32>, vector<1x8x8xf32>, vector<1x8x8xf32>, vector<1x8x8xf32> -> vector<4x8x8xf32>
    %cst_14 = arith.constant 0.353553385 : f32
    %41 = vector.broadcast %cst_14 : f32 to vector<4x8x8xf32>
    %42 = arith.mulf %40, %41 : vector<4x8x8xf32>
    %43 = vector.extract_strided_slice %31 {offsets = [0, 32], sizes = [8, 8], strides = [1, 1]} : vector<8x96xf32> to vector<8x8xf32>
    %44 = vector.extract_strided_slice %31 {offsets = [0, 40], sizes = [8, 8], strides = [1, 1]} : vector<8x96xf32> to vector<8x8xf32>
    %45 = vector.extract_strided_slice %31 {offsets = [0, 48], sizes = [8, 8], strides = [1, 1]} : vector<8x96xf32> to vector<8x8xf32>
    %46 = vector.extract_strided_slice %31 {offsets = [0, 56], sizes = [8, 8], strides = [1, 1]} : vector<8x96xf32> to vector<8x8xf32>
    %47 = vector.shape_cast %43 : vector<8x8xf32> to vector<1x8x8xf32>
    %48 = vector.shape_cast %44 : vector<8x8xf32> to vector<1x8x8xf32>
    %49 = vector.shape_cast %45 : vector<8x8xf32> to vector<1x8x8xf32>
    %50 = vector.shape_cast %46 : vector<8x8xf32> to vector<1x8x8xf32>
    %51 = tpu.concatenate %47, %48, %49, %50 in 0 : vector<1x8x8xf32>, vector<1x8x8xf32>, vector<1x8x8xf32>, vector<1x8x8xf32> -> vector<4x8x8xf32>
    %52 = vector.extract_strided_slice %31 {offsets = [0, 64], sizes = [8, 8], strides = [1, 1]} : vector<8x96xf32> to vector<8x8xf32>
    %53 = vector.extract_strided_slice %31 {offsets = [0, 72], sizes = [8, 8], strides = [1, 1]} : vector<8x96xf32> to vector<8x8xf32>
    %54 = vector.extract_strided_slice %31 {offsets = [0, 80], sizes = [8, 8], strides = [1, 1]} : vector<8x96xf32> to vector<8x8xf32>
    %55 = vector.extract_strided_slice %31 {offsets = [0, 88], sizes = [8, 8], strides = [1, 1]} : vector<8x96xf32> to vector<8x8xf32>
    %56 = vector.shape_cast %52 : vector<8x8xf32> to vector<1x8x8xf32>
    %57 = vector.shape_cast %53 : vector<8x8xf32> to vector<1x8x8xf32>
    %58 = vector.shape_cast %54 : vector<8x8xf32> to vector<1x8x8xf32>
    %59 = vector.shape_cast %55 : vector<8x8xf32> to vector<1x8x8xf32>
    %60 = tpu.concatenate %56, %57, %58, %59 in 0 : vector<1x8x8xf32>, vector<1x8x8xf32>, vector<1x8x8xf32>, vector<1x8x8xf32> -> vector<4x8x8xf32>
    "tpu.trace_start"() <{level = 10 : i32, message = "hqd,hkd->hqk"}> : () -> ()
    %cst_15 = arith.constant dense<0.000000e+00> : vector<4x8x8xf32>
    %61 = tpu.matmul %42, %51, %cst_15 {dimension_numbers = #tpu.dot_dimension_numbers<[2], [2], [1], [1], [0, 0, 0, 1, 1, 1], [0], [0]>} : vector<4x8x8xf32>, vector<4x8x8xf32>, vector<4x8x8xf32> -> vector<4x8x8xf32>
    "tpu.trace_stop"() : () -> ()
    %c0_16 = arith.constant 0 : index
    %c0_17 = arith.constant 0 : index
    %c0_18 = arith.constant 0 : index
    %62 = vector.load %arg2[%c0_16, %c0_17, %c0_18] : memref<2x1x8xf32, #tpu.memory_space<vmem>>, vector<1x1x8xf32>
    %63 = vector.shape_cast %62 : vector<1x1x8xf32> to vector<1x8xf32>
    %64 = vector.shape_cast %63 : vector<1x8xf32> to vector<1x1x8xf32>
    %65 = vector.broadcast %64 : vector<1x1x8xf32> to vector<4x8x8xf32>
    %66 = arith.addf %61, %65 : vector<4x8x8xf32>
    %cst_19 = arith.constant dense<0xFF800000> : vector<4x8xf32>
    %67 = vector.multi_reduction <maximumf>, %66, %cst_19 [2] : vector<4x8x8xf32> to vector<4x8xf32>
    %68 = vector.shape_cast %67 : vector<4x8xf32> to vector<4x8x1xf32>
    %69 = vector.broadcast %68 : vector<4x8x1xf32> to vector<4x8x8xf32>
    %70 = arith.subf %66, %69 : vector<4x8x8xf32>
    %71 = math.exp %70 : vector<4x8x8xf32>
    %cst_20 = arith.constant dense<0.000000e+00> : vector<4x8xf32>
    %72 = vector.multi_reduction <add>, %71, %cst_20 [2] : vector<4x8x8xf32> to vector<4x8xf32>
    %73 = vector.shape_cast %72 : vector<4x8xf32> to vector<4x8x1xf32>
    %74 = tpu.reciprocal %73 {approx = true} : vector<4x8x1xf32> -> vector<4x8x1xf32>
    %75 = vector.broadcast %74 : vector<4x8x1xf32> to vector<4x8x8xf32>
    %76 = arith.mulf %71, %75 : vector<4x8x8xf32>
    "tpu.trace_start"() <{level = 10 : i32, message = "hqk,hkd->hqd"}> : () -> ()
    %cst_21 = arith.constant dense<0.000000e+00> : vector<4x8x8xf32>
    %77 = tpu.matmul %76, %60, %cst_21 {dimension_numbers = #tpu.dot_dimension_numbers<[2], [1], [1], [2], [0, 0, 0, 1, 1, 2], [0], [0]>} : vector<4x8x8xf32>, vector<4x8x8xf32>, vector<4x8x8xf32> -> vector<4x8x8xf32>
    "tpu.trace_stop"() : () -> ()
    %78 = vector.extract_strided_slice %77 {offsets = [0, 0, 0], sizes = [1, 8, 8], strides = [1, 1, 1]} : vector<4x8x8xf32> to vector<1x8x8xf32>
    %79 = vector.shape_cast %78 : vector<1x8x8xf32> to vector<8x8xf32>
    %80 = vector.extract_strided_slice %77 {offsets = [1, 0, 0], sizes = [1, 8, 8], strides = [1, 1, 1]} : vector<4x8x8xf32> to vector<1x8x8xf32>
    %81 = vector.shape_cast %80 : vector<1x8x8xf32> to vector<8x8xf32>
    %82 = vector.extract_strided_slice %77 {offsets = [2, 0, 0], sizes = [1, 8, 8], strides = [1, 1, 1]} : vector<4x8x8xf32> to vector<1x8x8xf32>
    %83 = vector.shape_cast %82 : vector<1x8x8xf32> to vector<8x8xf32>
    %84 = vector.extract_strided_slice %77 {offsets = [3, 0, 0], sizes = [1, 8, 8], strides = [1, 1, 1]} : vector<4x8x8xf32> to vector<1x8x8xf32>
    %85 = vector.shape_cast %84 : vector<1x8x8xf32> to vector<8x8xf32>
    %86 = tpu.concatenate %79, %81, %83, %85 in 1 : vector<8x8xf32>, vector<8x8xf32>, vector<8x8xf32>, vector<8x8xf32> -> vector<8x32xf32>
    %87 = vector.extract_strided_slice %30 {offsets = [8, 0], sizes = [8, 96], strides = [1, 1]} : vector<16x96xf32> to vector<8x96xf32>
    %88 = vector.extract_strided_slice %87 {offsets = [0, 0], sizes = [8, 8], strides = [1, 1]} : vector<8x96xf32> to vector<8x8xf32>
    %89 = vector.extract_strided_slice %87 {offsets = [0, 8], sizes = [8, 8], strides = [1, 1]} : vector<8x96xf32> to vector<8x8xf32>
    %90 = vector.extract_strided_slice %87 {offsets = [0, 16], sizes = [8, 8], strides = [1, 1]} : vector<8x96xf32> to vector<8x8xf32>
    %91 = vector.extract_strided_slice %87 {offsets = [0, 24], sizes = [8, 8], strides = [1, 1]} : vector<8x96xf32> to vector<8x8xf32>
    %92 = vector.shape_cast %88 : vector<8x8xf32> to vector<1x8x8xf32>
    %93 = vector.shape_cast %89 : vector<8x8xf32> to vector<1x8x8xf32>
    %94 = vector.shape_cast %90 : vector<8x8xf32> to vector<1x8x8xf32>
    %95 = vector.shape_cast %91 : vector<8x8xf32> to vector<1x8x8xf32>
    %96 = tpu.concatenate %92, %93, %94, %95 in 0 : vector<1x8x8xf32>, vector<1x8x8xf32>, vector<1x8x8xf32>, vector<1x8x8xf32> -> vector<4x8x8xf32>
    %cst_22 = arith.constant 0.353553385 : f32
    %97 = vector.broadcast %cst_22 : f32 to vector<4x8x8xf32>
    %98 = arith.mulf %96, %97 : vector<4x8x8xf32>
    %99 = vector.extract_strided_slice %87 {offsets = [0, 32], sizes = [8, 8], strides = [1, 1]} : vector<8x96xf32> to vector<8x8xf32>
    %100 = vector.extract_strided_slice %87 {offsets = [0, 40], sizes = [8, 8], strides = [1, 1]} : vector<8x96xf32> to vector<8x8xf32>
    %101 = vector.extract_strided_slice %87 {offsets = [0, 48], sizes = [8, 8], strides = [1, 1]} : vector<8x96xf32> to vector<8x8xf32>
    %102 = vector.extract_strided_slice %87 {offsets = [0, 56], sizes = [8, 8], strides = [1, 1]} : vector<8x96xf32> to vector<8x8xf32>
    %103 = vector.shape_cast %99 : vector<8x8xf32> to vector<1x8x8xf32>
    %104 = vector.shape_cast %100 : vector<8x8xf32> to vector<1x8x8xf32>
    %105 = vector.shape_cast %101 : vector<8x8xf32> to vector<1x8x8xf32>
    %106 = vector.shape_cast %102 : vector<8x8xf32> to vector<1x8x8xf32>
    %107 = tpu.concatenate %103, %104, %105, %106 in 0 : vector<1x8x8xf32>, vector<1x8x8xf32>, vector<1x8x8xf32>, vector<1x8x8xf32> -> vector<4x8x8xf32>
    %108 = vector.extract_strided_slice %87 {offsets = [0, 64], sizes = [8, 8], strides = [1, 1]} : vector<8x96xf32> to vector<8x8xf32>
    %109 = vector.extract_strided_slice %87 {offsets = [0, 72], sizes = [8, 8], strides = [1, 1]} : vector<8x96xf32> to vector<8x8xf32>
    %110 = vector.extract_strided_slice %87 {offsets = [0, 80], sizes = [8, 8], strides = [1, 1]} : vector<8x96xf32> to vector<8x8xf32>
    %111 = vector.extract_strided_slice %87 {offsets = [0, 88], sizes = [8, 8], strides = [1, 1]} : vector<8x96xf32> to vector<8x8xf32>
    %112 = vector.shape_cast %108 : vector<8x8xf32> to vector<1x8x8xf32>
    %113 = vector.shape_cast %109 : vector<8x8xf32> to vector<1x8x8xf32>
    %114 = vector.shape_cast %110 : vector<8x8xf32> to vector<1x8x8xf32>
    %115 = vector.shape_cast %111 : vector<8x8xf32> to vector<1x8x8xf32>
    %116 = tpu.concatenate %112, %113, %114, %115 in 0 : vector<1x8x8xf32>, vector<1x8x8xf32>, vector<1x8x8xf32>, vector<1x8x8xf32> -> vector<4x8x8xf32>
    "tpu.trace_start"() <{level = 10 : i32, message = "hqd,hkd->hqk"}> : () -> ()
    %cst_23 = arith.constant dense<0.000000e+00> : vector<4x8x8xf32>
    %117 = tpu.matmul %98, %107, %cst_23 {dimension_numbers = #tpu.dot_dimension_numbers<[2], [2], [1], [1], [0, 0, 0, 1, 1, 1], [0], [0]>} : vector<4x8x8xf32>, vector<4x8x8xf32>, vector<4x8x8xf32> -> vector<4x8x8xf32>
    "tpu.trace_stop"() : () -> ()
    %c1_24 = arith.constant 1 : index
    %c0_25 = arith.constant 0 : index
    %c0_26 = arith.constant 0 : index
    %118 = vector.load %arg2[%c1_24, %c0_25, %c0_26] : memref<2x1x8xf32, #tpu.memory_space<vmem>>, vector<1x1x8xf32>
    %119 = vector.shape_cast %118 : vector<1x1x8xf32> to vector<1x8xf32>
    %120 = vector.shape_cast %119 : vector<1x8xf32> to vector<1x1x8xf32>
    %121 = vector.broadcast %120 : vector<1x1x8xf32> to vector<4x8x8xf32>
    %122 = arith.addf %117, %121 : vector<4x8x8xf32>
    %cst_27 = arith.constant dense<0xFF800000> : vector<4x8xf32>
    %123 = vector.multi_reduction <maximumf>, %122, %cst_27 [2] : vector<4x8x8xf32> to vector<4x8xf32>
    %124 = vector.shape_cast %123 : vector<4x8xf32> to vector<4x8x1xf32>
    %125 = vector.broadcast %124 : vector<4x8x1xf32> to vector<4x8x8xf32>
    %126 = arith.subf %122, %125 : vector<4x8x8xf32>
    %127 = math.exp %126 : vector<4x8x8xf32>
    %cst_28 = arith.constant dense<0.000000e+00> : vector<4x8xf32>
    %128 = vector.multi_reduction <add>, %127, %cst_28 [2] : vector<4x8x8xf32> to vector<4x8xf32>
    %129 = vector.shape_cast %128 : vector<4x8xf32> to vector<4x8x1xf32>
    %130 = tpu.reciprocal %129 {approx = true} : vector<4x8x1xf32> -> vector<4x8x1xf32>
    %131 = vector.broadcast %130 : vector<4x8x1xf32> to vector<4x8x8xf32>
    %132 = arith.mulf %127, %131 : vector<4x8x8xf32>
    "tpu.trace_start"() <{level = 10 : i32, message = "hqk,hkd->hqd"}> : () -> ()
    %cst_29 = arith.constant dense<0.000000e+00> : vector<4x8x8xf32>
    %133 = tpu.matmul %132, %116, %cst_29 {dimension_numbers = #tpu.dot_dimension_numbers<[2], [1], [1], [2], [0, 0, 0, 1, 1, 2], [0], [0]>} : vector<4x8x8xf32>, vector<4x8x8xf32>, vector<4x8x8xf32> -> vector<4x8x8xf32>
    "tpu.trace_stop"() : () -> ()
    %134 = vector.extract_strided_slice %133 {offsets = [0, 0, 0], sizes = [1, 8, 8], strides = [1, 1, 1]} : vector<4x8x8xf32> to vector<1x8x8xf32>
    %135 = vector.shape_cast %134 : vector<1x8x8xf32> to vector<8x8xf32>
    %136 = vector.extract_strided_slice %133 {offsets = [1, 0, 0], sizes = [1, 8, 8], strides = [1, 1, 1]} : vector<4x8x8xf32> to vector<1x8x8xf32>
    %137 = vector.shape_cast %136 : vector<1x8x8xf32> to vector<8x8xf32>
    %138 = vector.extract_strided_slice %133 {offsets = [2, 0, 0], sizes = [1, 8, 8], strides = [1, 1, 1]} : vector<4x8x8xf32> to vector<1x8x8xf32>
    %139 = vector.shape_cast %138 : vector<1x8x8xf32> to vector<8x8xf32>
    %140 = vector.extract_strided_slice %133 {offsets = [3, 0, 0], sizes = [1, 8, 8], strides = [1, 1, 1]} : vector<4x8x8xf32> to vector<1x8x8xf32>
    %141 = vector.shape_cast %140 : vector<1x8x8xf32> to vector<8x8xf32>
    %142 = tpu.concatenate %135, %137, %139, %141 in 1 : vector<8x8xf32>, vector<8x8xf32>, vector<8x8xf32>, vector<8x8xf32> -> vector<8x32xf32>
    %143 = tpu.concatenate %86, %142 in 0 : vector<8x32xf32>, vector<8x32xf32> -> vector<16x32xf32>
    %c0_30 = arith.constant 0 : index
    %c0_31 = arith.constant 0 : index
    %144 = vector.load %arg5[%c0_30, %c0_31] : memref<32x32xf32, #tpu.memory_space<vmem>>, vector<32x32xf32>
    %cst_32 = arith.constant dense<0.000000e+00> : vector<16x32xf32>
    %145 = tpu.matmul %143, %144, %cst_32 {dimension_numbers = #tpu.dot_dimension_numbers<[1], [0], [0], [1], [0, 0, 1, 1], [], []>} : vector<16x32xf32>, vector<32x32xf32>, vector<16x32xf32> -> vector<16x32xf32>
    %c0_33 = arith.constant 0 : index
    %c0_34 = arith.constant 0 : index
    %146 = vector.load %arg6[%c0_33, %c0_34] : memref<1x32xf32, #tpu.memory_space<vmem>>, vector<1x32xf32>
    %147 = vector.broadcast %146 : vector<1x32xf32> to vector<16x32xf32>
    %148 = arith.addf %145, %147 : vector<16x32xf32>
    %149 = arith.addf %148, %1 : vector<16x32xf32>
    %c2 = arith.constant 2 : index
    %c0_35 = arith.constant 0 : index
    %150 = vector.load %arg7[%c2, %c0_35] : memref<4x32xf32, #tpu.memory_space<vmem>>, vector<1x32xf32>
    %c3 = arith.constant 3 : index
    %c0_36 = arith.constant 0 : index
    %151 = vector.load %arg7[%c3, %c0_36] : memref<4x32xf32, #tpu.memory_space<vmem>>, vector<1x32xf32>
    %cst_37 = arith.constant dense<0.000000e+00> : vector<16xf32>
    %152 = vector.multi_reduction <add>, %149, %cst_37 [1] : vector<16x32xf32> to vector<16xf32>
    %153 = vector.shape_cast %152 : vector<16xf32> to vector<16x1xf32>
    %cst_38 = arith.constant 3.200000e+01 : f32
    %154 = vector.broadcast %cst_38 : f32 to vector<16x1xf32>
    %155 = arith.divf %153, %154 : vector<16x1xf32>
    %156 = vector.broadcast %155 : vector<16x1xf32> to vector<16x32xf32>
    %157 = arith.subf %149, %156 : vector<16x32xf32>
    %158 = arith.mulf %157, %157 : vector<16x32xf32>
    %cst_39 = arith.constant dense<0.000000e+00> : vector<16xf32>
    %159 = vector.multi_reduction <add>, %158, %cst_39 [1] : vector<16x32xf32> to vector<16xf32>
    %160 = vector.shape_cast %159 : vector<16xf32> to vector<16x1xf32>
    %cst_40 = arith.constant 3.200000e+01 : f32
    %161 = vector.broadcast %cst_40 : f32 to vector<16x1xf32>
    %162 = arith.divf %160, %161 : vector<16x1xf32>
    %163 = vector.broadcast %155 : vector<16x1xf32> to vector<16x32xf32>
    %164 = arith.subf %149, %163 : vector<16x32xf32>
    %cst_41 = arith.constant 9.99999997E-7 : f32
    %165 = vector.broadcast %cst_41 : f32 to vector<16x1xf32>
    %166 = arith.addf %162, %165 : vector<16x1xf32>
    %167 = math.rsqrt %166 : vector<16x1xf32>
    %168 = vector.broadcast %167 : vector<16x1xf32> to vector<16x32xf32>
    %169 = arith.mulf %164, %168 : vector<16x32xf32>
    %170 = vector.broadcast %150 : vector<1x32xf32> to vector<16x32xf32>
    %171 = arith.mulf %169, %170 : vector<16x32xf32>
    %172 = vector.broadcast %151 : vector<1x32xf32> to vector<16x32xf32>
    %173 = arith.addf %171, %172 : vector<16x32xf32>
    %c0_42 = arith.constant 0 : index
    %c0_43 = arith.constant 0 : index
    %174 = vector.load %arg8[%c0_42, %c0_43] : memref<32x64xf32, #tpu.memory_space<vmem>>, vector<32x64xf32>
    %cst_44 = arith.constant dense<0.000000e+00> : vector<16x64xf32>
    %175 = tpu.matmul %173, %174, %cst_44 {dimension_numbers = #tpu.dot_dimension_numbers<[1], [0], [0], [1], [0, 0, 1, 1], [], []>} : vector<16x32xf32>, vector<32x64xf32>, vector<16x64xf32> -> vector<16x64xf32>
    %c0_45 = arith.constant 0 : index
    %c0_46 = arith.constant 0 : index
    %176 = vector.load %arg9[%c0_45, %c0_46] : memref<1x64xf32, #tpu.memory_space<vmem>>, vector<1x64xf32>
    %177 = vector.broadcast %176 : vector<1x64xf32> to vector<16x64xf32>
    %178 = arith.addf %175, %177 : vector<16x64xf32>
    %cst_47 = arith.constant 5.000000e-01 : f32
    %179 = vector.broadcast %cst_47 : f32 to vector<16x64xf32>
    %180 = arith.mulf %179, %178 : vector<16x64xf32>
    %cst_48 = arith.constant 4.471500e-02 : f32
    %181 = vector.broadcast %cst_48 : f32 to vector<16x64xf32>
    %182 = arith.mulf %181, %178 : vector<16x64xf32>
    %183 = arith.mulf %182, %178 : vector<16x64xf32>
    %184 = arith.mulf %183, %178 : vector<16x64xf32>
    %185 = arith.addf %178, %184 : vector<16x64xf32>
    %cst_49 = arith.constant 0.797884583 : f32
    %186 = vector.broadcast %cst_49 : f32 to vector<16x64xf32>
    %187 = arith.mulf %186, %185 : vector<16x64xf32>
    %188 = math.tanh %187 : vector<16x64xf32>
    %cst_50 = arith.constant 1.000000e+00 : f32
    %189 = vector.broadcast %cst_50 : f32 to vector<16x64xf32>
    %190 = arith.addf %189, %188 : vector<16x64xf32>
    %191 = arith.mulf %180, %190 : vector<16x64xf32>
    %c0_51 = arith.constant 0 : index
    %c0_52 = arith.constant 0 : index
    %192 = vector.load %arg10[%c0_51, %c0_52] : memref<64x32xf32, #tpu.memory_space<vmem>>, vector<64x32xf32>
    %cst_53 = arith.constant dense<0.000000e+00> : vector<16x32xf32>
    %193 = tpu.matmul %191, %192, %cst_53 {dimension_numbers = #tpu.dot_dimension_numbers<[1], [0], [0], [1], [0, 0, 1, 1], [], []>} : vector<16x64xf32>, vector<64x32xf32>, vector<16x32xf32> -> vector<16x32xf32>
    %c0_54 = arith.constant 0 : index
    %c0_55 = arith.constant 0 : index
    %194 = vector.load %arg11[%c0_54, %c0_55] : memref<1x32xf32, #tpu.memory_space<vmem>>, vector<1x32xf32>
    %195 = vector.broadcast %194 : vector<1x32xf32> to vector<16x32xf32>
    %196 = arith.addf %193, %195 : vector<16x32xf32>
    %197 = arith.addf %196, %149 : vector<16x32xf32>
    %198 = vector.shape_cast %197 : vector<16x32xf32> to vector<2x8x32xf32>
    %c0_56 = arith.constant 0 : index
    %c0_57 = arith.constant 0 : index
    %c0_58 = arith.constant 0 : index
    %199 = vector.load %arg12[%c0_56, %c0_57, %c0_58] : memref<2x8x32xf32, #tpu.memory_space<vmem>>, vector<2x8x32xf32>
    tpu.vector_store %arg12[%c0_56, %c0_57, %c0_58], %198 {strides = array<i32>} : memref<2x8x32xf32, #tpu.memory_space<vmem>>, vector<2x8x32xf32>,
    return
  }
  func.func @transform_0(%arg0: i32) -> (i32, i32, i32) {
    %c0_i32 = arith.constant 0 : i32
    %c0_i32_0 = arith.constant 0 : i32
    %c0_i32_1 = arith.constant 0 : i32
    return %arg0, %c0_i32, %c0_i32_0 : i32, i32, i32
  }
  func.func @transform_1(%arg0: i32) -> (i32, i32, i32) {
    %c0_i32 = arith.constant 0 : i32
    %c0_i32_0 = arith.constant 0 : i32
    %c0_i32_1 = arith.constant 0 : i32
    return %arg0, %c0_i32, %c0_i32_0 : i32, i32, i32
  }
  func.func @transform_2(%arg0: i32) -> (i32, i32) {
    %c0_i32 = arith.constant 0 : i32
    %c0_i32_0 = arith.constant 0 : i32
    %c0_i32_1 = arith.constant 0 : i32
    return %c0_i32, %c0_i32_0 : i32, i32
  }
  func.func @transform_3(%arg0: i32) -> (i32, i32) {
    %c0_i32 = arith.constant 0 : i32
    %c0_i32_0 = arith.constant 0 : i32
    %c0_i32_1 = arith.constant 0 : i32
    return %c0_i32, %c0_i32_0 : i32, i32
  }
  func.func @transform_4(%arg0: i32) -> (i32, i32) {
    %c0_i32 = arith.constant 0 : i32
    %c0_i32_0 = arith.constant 0 : i32
    %c0_i32_1 = arith.constant 0 : i32
    return %c0_i32, %c0_i32_0 : i32, i32
  }
  func.func @transform_5(%arg0: i32) -> (i32, i32) {
    %c0_i32 = arith.constant 0 : i32
    %c0_i32_0 = arith.constant 0 : i32
    %c0_i32_1 = arith.constant 0 : i32
    return %c0_i32, %c0_i32_0 : i32, i32
  }
  func.func @transform_6(%arg0: i32) -> (i32, i32) {
    %c0_i32 = arith.constant 0 : i32
    %c0_i32_0 = arith.constant 0 : i32
    %c0_i32_1 = arith.constant 0 : i32
    return %c0_i32, %c0_i32_0 : i32, i32
  }
  func.func @transform_7(%arg0: i32) -> (i32, i32) {
    %c0_i32 = arith.constant 0 : i32
    %c0_i32_0 = arith.constant 0 : i32
    %c0_i32_1 = arith.constant 0 : i32
    return %c0_i32, %c0_i32_0 : i32, i32
  }
  func.func @transform_8(%arg0: i32) -> (i32, i32) {
    %c0_i32 = arith.constant 0 : i32
    %c0_i32_0 = arith.constant 0 : i32
    %c0_i32_1 = arith.constant 0 : i32
    return %c0_i32, %c0_i32_0 : i32, i32
  }
  func.func @transform_9(%arg0: i32) -> (i32, i32) {
    %c0_i32 = arith.constant 0 : i32
    %c0_i32_0 = arith.constant 0 : i32
    %c0_i32_1 = arith.constant 0 : i32
    return %c0_i32, %c0_i32_0 : i32, i32
  }
  func.func @transform_10(%arg0: i32) -> (i32, i32) {
    %c0_i32 = arith.constant 0 : i32
    %c0_i32_0 = arith.constant 0 : i32
    %c0_i32_1 = arith.constant 0 : i32
    return %c0_i32, %c0_i32_0 : i32, i32
  }
  func.func @transform_11(%arg0: i32) -> (i32, i32, i32) {
    %c0_i32 = arith.constant 0 : i32
    %c0_i32_0 = arith.constant 0 : i32
    %c0_i32_1 = arith.constant 0 : i32
    return %arg0, %c0_i32, %c0_i32_0 : i32, i32, i32
  }
}

</mosaic_0001>

<bundles_post_ra>
// kernel: tpu_custom_call.1
= control target key start
LH: loop header
LB: loop body
LE: loop exit
PB: predicated region body
PF: predicated region fallthrough
CT: control target
= control target key end

     0   :  { %16 = vsyncpa [#allocation3], 0  ;;  %s2882_s0 = inlined_call_operand.hbm [shape: f32[2,8,32], index: 0, kind: input, shape index: {}]   ;;  %s2883_s1 = inlined_call_operand.vmem [shape: f32[2,1,8], index: 1, kind: input, shape index: {}]   ;;  %s2884_s2 = inlined_call_operand.vmem [shape: f32[32,96], index: 2, kind: input, shape index: {}]   ;;  %s2885_s3 = inlined_call_operand.hbm [shape: f32[1,96], index: 3, kind: input, shape index: {}]   ;;  %s2886_s4 = inlined_call_operand.vmem [shape: f32[32,32], index: 4, kind: input, shape index: {}]   ;;  %s2887_s5 = inlined_call_operand.hbm [shape: f32[1,32], index: 5, kind: input, shape index: {}]   ;;  %s2888_s6 = inlined_call_operand.hbm [shape: f32[4,32], index: 6, kind: input, shape index: {}]   ;;  %s2889_s7 = inlined_call_operand.vmem [shape: f32[32,64], index: 7, kind: input, shape index: {}]   ;;  %s2890_s8 = inlined_call_operand.hbm [shape: f32[1,64], index: 8, kind: input, shape index: {}]   ;;  %s2891_s9 = inlined_call_operand.vmem [shape: f32[64,32], index: 9, kind: input, shape index: {}]   ;;  %s2892_s10 = inlined_call_operand.vmem [shape: f32[1,32], index: 10, kind: input, shape index: {}]   ;;  %s2893_s11 = inlined_call_operand.hbm [shape: f32[2,8,32], index: 11, kind: output, shape index: {}]  }
   0x1   :  { %17 = vsyncpa [#allocation6], 0 }
   0x2   :  { %18 = vsyncpa [#allocation9], 0 }
   0x3   :  { %19 = vsyncpa [#allocation4], 0  ;;  %s2463_s17 = smov [#allocation5]   ;;  %s2464_s19 = smov [#allocation8]  }
   0x4   :  { %s42_s18 = sshll.u32 %s2463_s17, 4  ;;  %s64_s20 = sshll.u32 %s2464_s19, 4  ;;  %s43_s18 = int_to_ptr.vmem [resolvable:$true] %s42_s18  ;;  %s65_s20 = int_to_ptr.vmem [resolvable:$true] %s64_s20 }
   0x5   :  { %s2323_s23 = scalar_lea.hbm %s2885_s3, 16 }
   0x6   :  { %p2324_p0 = scmp.ne.s32.totalorder %s2885_s3, %s2323_s23  ;;  %p2327_p1 = scmp.lt.u32.totalorder %s2323_s23, %s2885_s3 }
   0x8   :  { %p2329_p2 = pnand %p2327_p1, %p2324_p0 }
   0xa   :  { %2332 = shalt.err (!%p2329_p2)
}
   0xb   :  { %s2333_s28 = scalar_lea.vmem %s43_s18, 16  ;;  %s2337_s29 = scalar_lea.vmem %s43_s18, 32 }
   0xc   :  { %p2334_p3 = scmp.ne.s32.totalorder %s43_s18, %s2333_s28  ;;  %p2338_p4 = scmp.lt.s32.totalorder %s43_s18, %s43_s18 }
   0xd   :  { %p2339_p5 = scmp.lt.s32.totalorder %s2337_s29, %s2333_s28 }
   0xf   :  { %p2340_p6 = por %p2339_p5, %p2338_p4 }
  0x11   :  { %p2341_p7 = pnand %p2340_p6, %p2334_p3 }
  0x13   :  { %2344 = shalt.err (!%p2341_p7)
}
  0x14   :  { %45 = dma.hbm_to_vmem [thread:$0]  %s2885_s3, 16, %s43_s18, [#allocation6]  }
  0x15   :  { %s2345_s15 = scalar_lea.hbm %s2888_s6, 64 }
  0x16   :  { %p2346_p8 = scmp.ne.s32.totalorder %s2888_s6, %s2345_s15  ;;  %p2349_p9 = scmp.lt.u32.totalorder %s2345_s15, %s2888_s6 }
  0x18   :  { %p2351_p10 = pnand %p2349_p9, %p2346_p8 }
  0x1a   :  { %2354 = shalt.err (!%p2351_p10)
}
  0x1b   :  { %s2355_s22 = scalar_lea.vmem %s65_s20, 64  ;;  %p2360_p12 = scmp.lt.s32.totalorder %s65_s20, %s65_s20 }
  0x1c   :  { %p2356_p11 = scmp.ne.s32.totalorder %s65_s20, %s2355_s22  ;;  %p2361_p13 = scmp.lt.s32.totalorder %s2355_s22, %s2355_s22 }
  0x1e   :  { %p2362_p0 = por %p2361_p13, %p2360_p12 }
  0x20   :  { %p2363_p1 = pnand %p2362_p0, %p2356_p11 }
  0x22   :  { %2366 = shalt.err (!%p2363_p1)
}
  0x23   :  { %67 = dma.hbm_to_vmem [thread:$0]  %s2888_s6, 64, %s65_s20, [#allocation9]  }
  0x24   :  { %s2465_s23 = smov [#allocation2]   ;;  %s2367_s27 = scalar_lea.hbm %s2882_s0, 256 }
  0x25   :  { %s25_s24 = sshll.u32 %s2465_s23, 4  ;;  %p2368_p2 = scmp.ne.s32.totalorder %s2882_s0, %s2367_s27  ;;  %s26_s24 = int_to_ptr.vmem [resolvable:$true] %s25_s24 }
  0x26   :  { %p2371_p3 = scmp.lt.u32.totalorder %s2367_s27, %s2882_s0 }
  0x28   :  { %p2373_p4 = pnand %p2371_p3, %p2368_p2 }
  0x2a   :  { %2376 = shalt.err (!%p2373_p4)
}
  0x2b   :  { %s2377_s13 = scalar_lea.vmem %s26_s24, 256  ;;  %p2382_p6 = scmp.lt.s32.totalorder %s26_s24, %s26_s24 }
  0x2c   :  { %p2378_p5 = scmp.ne.s32.totalorder %s26_s24, %s2377_s13  ;;  %p2383_p7 = scmp.lt.s32.totalorder %s2377_s13, %s2377_s13 }
  0x2e   :  { %p2384_p8 = por %p2383_p7, %p2382_p6 }
  0x30   :  { %p2385_p9 = pnand %p2384_p8, %p2378_p5 }
  0x32   :  { %2388 = shalt.err (!%p2385_p9)
}
  0x33   :  { %s2466_s6 = smov 128   ;;  %s2467_s20 = smov 8  }
  0x34   :  { %31 = dma.hbm_to_vmem [thread:$0]  %s2882_s0, 256, %s26_s24, [#allocation3], %s2466_s6, %s2466_s6, %s2467_s20  }
  0x35   :  { %s2468_s16 = smov [#allocation7]   ;;  %s2469_s19 = smov [#allocation10]  }
  0x36   :  { %s54_s17 = sshll.u32 %s2468_s16, 4  ;;  %s76_s21 = sshll.u32 %s2469_s19, 4  ;;  %s55_s17 = int_to_ptr.vmem [resolvable:$true] %s54_s17  ;;  %s77_s21 = int_to_ptr.vmem [resolvable:$true] %s76_s21 }
  0x37   :  { %s2389_s18 = scalar_lea.hbm %s2887_s5, 16 }
  0x38   :  { %p2390_p10 = scmp.ne.s32.totalorder %s2887_s5, %s2389_s18  ;;  %p2393_p11 = scmp.lt.u32.totalorder %s2389_s18, %s2887_s5 }
  0x3a   :  { %p2395_p12 = pnand %p2393_p11, %p2390_p10 }
  0x3c   :  { %2398 = shalt.err (!%p2395_p12)
}
  0x3d   :  { %s2399_s0 = scalar_lea.vmem %s55_s17, 16  ;;  %s2403_s24 = scalar_lea.vmem %s55_s17, 32 }
  0x3e   :  { %p2400_p13 = scmp.ne.s32.totalorder %s55_s17, %s2399_s0  ;;  %p2404_p0 = scmp.lt.s32.totalorder %s55_s17, %s55_s17 }
  0x3f   :  { %p2405_p1 = scmp.lt.s32.totalorder %s2403_s24, %s2399_s0 }
  0x41   :  { %p2406_p2 = por %p2405_p1, %p2404_p0 }
  0x43   :  { %p2407_p3 = pnand %p2406_p2, %p2400_p13 }
  0x45   :  { %2410 = shalt.err (!%p2407_p3)
}
  0x46   :  { %57 = dma.hbm_to_vmem [thread:$0]  %s2887_s5, 16, %s55_s17, [#allocation6]  }
  0x47   :  { %s2411_s13 = scalar_lea.hbm %s2890_s8, 16 }
  0x48   :  { %p2412_p4 = scmp.ne.s32.totalorder %s2890_s8, %s2411_s13  ;;  %p2415_p5 = scmp.lt.u32.totalorder %s2411_s13, %s2890_s8 }
  0x4a   :  { %p2417_p6 = pnand %p2415_p5, %p2412_p4 }
  0x4c   :  { %2420 = shalt.err (!%p2417_p6)
}
  0x4d   :  { %s2421_s22 = scalar_lea.vmem %s77_s21, 16  ;;  %s2425_s3 = scalar_lea.vmem %s77_s21, 32 }
  0x4e   :  { %p2422_p7 = scmp.ne.s32.totalorder %s77_s21, %s2421_s22  ;;  %p2426_p8 = scmp.lt.s32.totalorder %s77_s21, %s77_s21 }
  0x4f   :  { %p2427_p9 = scmp.lt.s32.totalorder %s2425_s3, %s2421_s22 }
  0x51   :  { %p2428_p10 = por %p2427_p9, %p2426_p8 }
  0x53   :  { %p2429_p11 = pnand %p2428_p10, %p2422_p7 }
  0x55   :  { %2432 = shalt.err (!%p2429_p11)
}
  0x56   :  { %79 = dma.hbm_to_vmem [thread:$0]  %s2890_s8, 16, %s77_s21, [#allocation9]  }
  0x57   :  { %2455 = dma.done.wait [#allocation3], 256  }
  0x58   :  { %2456 = vsyncadd [#allocation3], 4294967040 }
  0x59   :  { %2457 = dma.done.wait [#allocation6], 32  }
  0x5a   :  { %2458 = vsyncadd [#allocation6], 4294967264 }
  0x5b   :  { %2459 = dma.done.wait [#allocation9], 80  }
  0x5c   :  { %2460 = vsyncadd [#allocation9], 4294967216  ;;  %vm103_vm0 = vcmask 261120   ;;  %v2603_v0 = vld [vmem:[#allocation2] sm:$0xff]  ;;  %v2605_v1 = vld [vmem:[#allocation2 + $0x8] sm:$0xff]  ;;  %v2470_v36 = vmov 0.0  }
  0x5d   :  { %v104_v2 = vsel %vm103_vm0, %v2603_v0, 0.0  ;;  %v107_v3 = vsel %vm103_vm0, %v2605_v1, 0.0  ;;  %v143_v14 = vld [vmem:[%s2884_s2] sm:$0xff]  ;;  %v144_v15 = vld [vmem:[%s2884_s2 + $0x8] sm:$0xff]  ;;  %v145_v16 = vld [vmem:[%s2884_s2 + $0x10] sm:$0xff]  ;;  %2111 = vmatprep.subr.mxu0 %v2470_v36  ;;  %vm2471_vm1 = vmmov 0  }
  0x5e   :  { %105 = vadd.xlane.f32.xlu0 %v104_v2  ;;  %v2222_v17 = vpack.c.bf16 %v144_v15, %v143_v14  ;;  %v146_v18 = vld [vmem:[%s2884_s2 + $0x18] sm:$0xff]  ;;  %v1987_v27 = vld [vmem:[#allocation8] ss:$0 sm:$0xff]  ;;  %v1988_v29 = vld [vmem:[#allocation8 + $0x1] ss:$0 sm:$0xff]  ;;  %2113 = vmatprep.mubr.msk.f32.mxu0 %vm2471_vm1, %v2470_v36  ;;  %s2472_s2 = smov 112  }
  0x5f   :  { %v2226_v19 = vpack.c.bf16 %v146_v18, %v145_v16  ;;  %v1989_v37 = vld [vmem:[#allocation5] ss:$0 sm:$0xff]  ;;  %s2473_s24 = smov 120   ;;  %s2474_s28 = smov 104   ;;  %vm258_vm2 = vcmask 64512   ;;  %vm926_vm3 = vcmask 130048  }
  0x60   :  { %2223 = vmatprep.subr.bf16.mxu1 %v2222_v17  ;;  %s2475_s29 = smov 96   ;;  %v1992_v53 = vld [vmem:[%s2883_s1] ss:$0 sm:$0xff]  ;;  %s2476_s13 = smov 64   ;;  %vm928_vm4 = vcmask 195584   ;;  %vm1882_vm5 = vcmask 523264  }
  0x61   :  { %2225 = vmatpush3.bf16.msra.mxu1 %v2222_v17  ;;  %s2478_s16 = smov 24   ;;  %s2479_s18 = smov [#allocation11]  }
  0x62   :  { %108 = vadd.xlane.f32.xlu0 %v107_v3  ;;  %2227 = vmatprep.subr.bf16.mxu1 %v2226_v19 }
  0x65   :  { %2229 = vmatpush3.bf16.msra.mxu1 %v2226_v19 }
  0x66   :  { %2101 = vmatprep.subr.mxu1 %v2470_v36 }
  0xeb   :  { %v106_v4 = vpop.xlane.xlu0 %105 }
  0xec   :  { %v111_v5 = vmul.f32 0.03125, %v106_v4 }
  0xee   :  { %v113_v6 = vsub.f32 %v2603_v0, %v111_v5 }
  0xef   :  { %v109_v7 = vpop.xlane.xlu0 %108 }
  0xf0   :  { %v112_v8 = vmul.f32 0.03125, %v109_v7  ;;  %v115_v9 = vmul.f32 %v113_v6, %v113_v6 }
  0xf2   :  { %v114_v10 = vsub.f32 %v2605_v1, %v112_v8  ;;  %v117_v11 = vsel %vm103_vm0, %v115_v9, 0.0 }
  0xf3   :  { %118 = vadd.xlane.f32.xlu1 %v117_v11 }
  0xf4   :  { %v116_v12 = vmul.f32 %v114_v10, %v114_v10 }
  0xf6   :  { %v120_v13 = vsel %vm103_vm0, %v116_v12, 0.0 }
  0xf7   :  { %121 = vadd.xlane.f32.xlu1 %v120_v13 }
 0x180   :  { %v119_v20 = vpop.xlane.xlu1 %118 }
 0x181   :  { %v123_v21 = vmul.f32 0.03125, %v119_v20 }
 0x183   :  { %v125_v22 = vadd.f32 1e-06, %v123_v21 }
 0x184   :  { %v122_v23 = vpop.xlane.xlu1 %121 }
 0x185   :  { %2279 = vrsqrt.f32 %v125_v22  ;;  %v124_v24 = vmul.f32 0.03125, %v122_v23 }
 0x187   :  { %v126_v25 = vadd.f32 1e-06, %v124_v24 }
 0x189   :  { %2281 = vrsqrt.f32 %v126_v25 }
 0x18f   :  { %v2280_v26 = vpop.eup %2279 }
 0x190   :  { %v129_v28 = vmul.f32 %v2280_v26, %v113_v6 }
 0x192   :  { %v135_v30 = vmul.f32 %v1987_v27, %v129_v28 }
 0x193   :  { %v2282_v31 = vpop.eup %2281 }
 0x194   :  { %v130_v32 = vmul.f32 %v2282_v31, %v114_v10  ;;  %v141_v33 = vadd.f32 %v1988_v29, %v135_v30 }
 0x196   :  { %v136_v34 = vmul.f32 %v1987_v27, %v130_v32  ;;  %2098 = vmatprep.mubr.msk.f32.mxu1 %vm103_vm0, %v141_v33 }
 0x198   :  { %v142_v35 = vadd.f32 %v1988_v29, %v136_v34 }
 0x19a   :  { %2099 = vmatmul.mubr.msk.f32.vlgmr.msra.gmra.mrb[0].mxu1 %vm103_vm0, %v142_v35 }
 0x19b   :  { %2103 = vmatprep.mubr.msk.f32.mxu1 %vm2471_vm1, %v2470_v36 }
 0x26d   :  { %v2100_v38 = vpop.f32.mrb[0].mxu1 }
 0x26e   :  { %v2635_v39 = vadd.f32 %v2100_v38, %v1989_v37  ;;  %v226_v40 = vpop.f32.mrb[1].mxu1 }
 0x26f   :  { %v2637_v41 = vadd.f32 %v1989_v37, %v226_v40 }
 0x271   :  { %239 = vrot.lane.b32.xlu1 %v2637_v41, %s2472_s2  ;;  %236 = vrot.lane.b32.xlu0 %v2637_v41, %s2473_s24  ;;  %v245_v46 = vmul.f32 0.35355338, %v2637_v41 }
 0x275   :  { %242 = vrot.lane.b32.xlu1 %v2637_v41, %s2474_s28 }
 0x279   :  { %256 = vrot.lane.b32.xlu1 %v2637_v41, %s2475_s29 }
 0x2e3   :  { %v240_v42 = vpop.permute.xlu1 %239  ;;  %v237_v43 = vpop.permute.xlu0 %236 }
 0x2e4   :  { %411 = vrot.lane.b32.xlu1 %v240_v42, %s2475_s29  ;;  %334 = vrot.lane.b32.xlu0 %v237_v43, %s2475_s29  ;;  %v247_v49 = vmul.f32 0.35355338, %v240_v42  ;;  %v246_v50 = vmul.f32 0.35355338, %v237_v43 }
 0x2e7   :  { %v243_v44 = vpop.permute.xlu1 %242 }
 0x2e8   :  { %488 = vrot.lane.b32.xlu0 %v243_v44, %s2475_s29  ;;  %v248_v52 = vmul.f32 0.35355338, %v243_v44 }
 0x2eb   :  { %v257_v45 = vpop.permute.xlu1 %256 }
 0x2ec   :  { %2102 = vmatpush3.xpose.msk.msra.mxu1 %vm258_vm2, %v257_v45 }
 0x2ed   :  { %2106 = vmatprep.subr.mxu1 %v2470_v36 }
 0x2ef   :  { %2104 = vmatmul.mubr.msk.f32.vlgmr.msra.gmra.mrb[2].mxu1 %vm258_vm2, %v245_v46 }
 0x2f0   :  { %2108 = vmatprep.mubr.msk.f32.mxu1 %vm2471_vm1, %v2470_v36 }
 0x356   :  { %v412_v47 = vpop.permute.xlu1 %411  ;;  %v335_v48 = vpop.permute.xlu0 %334 }
 0x357   :  { %2107 = vmatpush3.xpose.msk.msra.mxu1 %vm258_vm2, %v335_v48  ;;  %2112 = vmatpush3.xpose.msk.msra.mxu0 %vm258_vm2, %v412_v47 }
 0x358   :  { %2116 = vmatprep.subr.mxu1 %v2470_v36  ;;  %2121 = vmatprep.subr.mxu0 %v2470_v36 }
 0x35a   :  { %2114 = vmatmul.mubr.msk.f32.vlgmr.msra.gmra.mrb[0].mxu0 %vm258_vm2, %v247_v49  ;;  %v489_v51 = vpop.permute.xlu0 %488  ;;  %2109 = vmatmul.mubr.msk.f32.vlgmr.msra.gmra.mrb[4].mxu1 %vm258_vm2, %v246_v50 }
 0x35b   :  { %2117 = vmatpush3.xpose.msk.msra.mxu1 %vm258_vm2, %v489_v51  ;;  %2118 = vmatprep.mubr.msk.f32.mxu1 %vm2471_vm1, %v2470_v36  ;;  %v940_v51 = vmul.f32 0.35355338, %v2635_v39 }
 0x35c   :  { %2126 = vmatprep.subr.mxu1 %v2470_v36  ;;  %2123 = vmatprep.mubr.msk.f32.mxu0 %vm2471_vm1, %v2470_v36 }
 0x35e   :  { %2119 = vmatmul.mubr.msk.f32.vlgmr.msra.gmra.mrb[6].mxu1 %vm258_vm2, %v248_v52 }
 0x35f   :  { %2128 = vmatprep.mubr.msk.f32.mxu1 %vm2471_vm1, %v2470_v36 }
 0x3c2   :  { %v330_v54 = vpop.f32.mrb[2].mxu1 }
 0x3c3   :  { %v331_v55 = vadd.f32 %v1992_v53, %v330_v54  ;;  %v2105_v56 = vpop.f32.mrb[3].mxu1 }
 0x3c5   :  { %v565_v57 = vsel %vm258_vm2, %v331_v55, -inf }
 0x3c6   :  { %566 = vmax.xlane.f32.xlu1 %v565_v57 }
 0x3d7   :  { %931 = vrot.lane.b32.xlu1 %v2635_v39, %s2473_s24 }
 0x3db   :  { %937 = vrot.lane.b32.xlu1 %v2635_v39, %s2474_s28 }
 0x3df   :  { %685 = vrot.lane.b32.xlu1 %v237_v43, %s2476_s13 }
 0x3e3   :  { %761 = vrot.lane.b32.xlu1 %v240_v42, %s2476_s13 }
 0x3e7   :  { %837 = vrot.lane.b32.xlu1 %v243_v44, %s2476_s13 }
 0x42d   :  { %v407_v58 = vpop.f32.mrb[4].mxu1  ;;  %v484_v59 = vpop.f32.mrb[0].mxu0 }
 0x42e   :  { %v408_v60 = vadd.f32 %v1992_v53, %v407_v58  ;;  %v2110_v61 = vpop.f32.mrb[5].mxu1  ;;  %v2115_v62 = vpop.f32.mrb[1].mxu0  ;;  %v485_v63 = vadd.f32 %v1992_v53, %v484_v59 }
 0x430   :  { %v568_v2 = vsel %vm258_vm2, %v408_v60, -inf  ;;  %v571_v6 = vsel %vm258_vm2, %v485_v63, -inf }
 0x431   :  { %569 = vmax.xlane.f32.xlu0 %v568_v2  ;;  %v561_v3 = vpop.f32.mrb[6].mxu1 }
 0x432   :  { %v2120_v4 = vpop.f32.mrb[7].mxu1  ;;  %v562_v5 = vadd.f32 %v1992_v53, %v561_v3 }
 0x434   :  { %v574_v7 = vsel %vm258_vm2, %v562_v5, -inf }
 0x435   :  { %572 = vmax.xlane.f32.xlu0 %v571_v6 }
 0x439   :  { %575 = vmax.xlane.f32.xlu0 %v574_v7 }
 0x44f   :  { %934 = vrot.lane.b32.xlu0 %v2635_v39, %s2472_s2 }
 0x453   :  { %v567_v8 = vpop.xlane.xlu1 %566  ;;  %609 = vrot.lane.b32.xlu0 %v2637_v41, %s2476_s13 }
 0x454   :  { %v577_v9 = vsub.f32 %v331_v55, %v567_v8 }
 0x456   :  { %v581_v10 = vmul.f32 1.442695, %v577_v9 }
 0x457   :  { %v2689_v11 = vpop.permute.xlu1 %931 }
 0x458   :  { %2283 = vpow2.f32 %v581_v10  ;;  %v941_v53 = vmul.f32 0.35355338, %v2689_v11 }
 0x45b   :  { %v2691_v12 = vpop.permute.xlu1 %937 }
 0x45c   :  { %v943_v56 = vmul.f32 0.35355338, %v2691_v12 }
 0x45f   :  { %v686_v13 = vpop.permute.xlu1 %685 }
 0x460   :  { %2127 = vmatpush3.msra.mxu1 %v686_v13 }
 0x461   :  { %2136 = vmatprep.subr.mxu1 %v2470_v36 }
 0x462   :  { %v2284_v14 = vpop.eup %2283 }
 0x463   :  { %v589_v15 = vsel %vm258_vm2, %v2284_v14, 0.0  ;;  %v762_v33 = vpop.permute.xlu1 %761 }
 0x464   :  { %590 = vadd.xlane.f32.xlu1 %v589_v15 }
 0x467   :  { %v838_v34 = vpop.permute.xlu1 %837 }
 0x475   :  { %1029 = vrot.lane.b32.xlu1 %v2689_v11, %s2475_s29 }
 0x4be   :  { %v570_v16 = vpop.xlane.xlu0 %569 }
 0x4bf   :  { %v578_v17 = vsub.f32 %v408_v60, %v570_v16 }
 0x4c1   :  { %v583_v18 = vmul.f32 1.442695, %v578_v17 }
 0x4c2   :  { %v573_v19 = vpop.xlane.xlu0 %572 }
 0x4c3   :  { %2285 = vpow2.f32 %v583_v18  ;;  %v579_v20 = vsub.f32 %v485_v63, %v573_v19  ;;  %v2006_v63 = vld [vmem:[%s2883_s1 + $0x1] ss:$0 sm:$0xff]  ;;  %s2477_s1 = smov 16  }
 0x4c5   :  { %v585_v21 = vmul.f32 1.442695, %v579_v20 }
 0x4c6   :  { %v576_v22 = vpop.xlane.xlu0 %575 }
 0x4c7   :  { %2287 = vpow2.f32 %v585_v21  ;;  %v580_v23 = vsub.f32 %v562_v5, %v576_v22 }
 0x4c9   :  { %v587_v24 = vmul.f32 1.442695, %v580_v23 }
 0x4ca   :  { %v2697_v25 = vpop.permute.xlu0 %934 }
 0x4cb   :  { %2289 = vpow2.f32 %v587_v24  ;;  %v942_v54 = vmul.f32 0.35355338, %v2697_v25 }
 0x4cd   :  { %v2286_v26 = vpop.eup %2285 }
 0x4ce   :  { %v610_v27 = vpop.permute.xlu0 %609  ;;  %v592_v28 = vsel %vm258_vm2, %v2286_v26, 0.0 }
 0x4cf   :  { %593 = vadd.xlane.f32.xlu0 %v592_v28  ;;  %2122 = vmatpush3.msra.mxu0 %v610_v27 }
 0x4d0   :  { %2131 = vmatprep.subr.mxu0 %v2470_v36 }
 0x4d1   :  { %v2288_v29 = vpop.eup %2287 }
 0x4d2   :  { %v595_v30 = vsel %vm258_vm2, %v2288_v29, 0.0 }
 0x4d3   :  { %596 = vadd.xlane.f32.xlu0 %v595_v30 }
 0x4d5   :  { %v2290_v31 = vpop.eup %2289 }
 0x4d6   :  { %v598_v32 = vsel %vm258_vm2, %v2290_v31, 0.0 }
 0x4d7   :  { %599 = vadd.xlane.f32.xlu1 %v598_v32 }
 0x4e8   :  { %1183 = vrot.lane.b32.xlu1 %v2691_v12, %s2475_s29 }
 0x4e9   :  { %952 = vrot.lane.b32.xlu0 %v2635_v39, %s2475_s29 }
 0x4ed   :  { %1106 = vrot.lane.b32.xlu0 %v2697_v25, %s2475_s29 }
 0x4f1   :  { %v591_v35 = vpop.xlane.xlu1 %590 }
 0x4f2   :  { %2291 = vrcp.f32 %v591_v35 }
 0x4f5   :  { %v1030_v41 = vpop.permute.xlu1 %1029 }
 0x4fc   :  { %v2292_v37 = vpop.eup %2291 }
 0x4fd   :  { %v605_v38 = vmul.f32 %v2292_v37, %v2284_v14 }
 0x4ff   :  { %2124 = vmatmul.mubr.msk.f32.vlgmr.msra.gmra.mrb[2].mxu0 %vm258_vm2, %v605_v38 }
 0x500   :  { %2132 = vmatpush3.msra.mxu0 %v762_v33  ;;  %2133 = vmatprep.mubr.msk.f32.mxu0 %vm2471_vm1, %v2470_v36 }
 0x501   :  { %2141 = vmatprep.subr.mxu0 %v2470_v36 }
 0x55c   :  { %v594_v40 = vpop.xlane.xlu0 %593 }
 0x55d   :  { %2293 = vrcp.f32 %v594_v40 }
 0x560   :  { %v597_v42 = vpop.xlane.xlu0 %596 }
 0x561   :  { %2295 = vrcp.f32 %v597_v42 }
 0x564   :  { %v600_v43 = vpop.xlane.xlu1 %599  ;;  %v953_v48 = vpop.permute.xlu0 %952 }
 0x565   :  { %2297 = vrcp.f32 %v600_v43 }
 0x567   :  { %v2294_v44 = vpop.eup %2293 }
 0x568   :  { %v606_v45 = vmul.f32 %v2294_v44, %v2286_v26  ;;  %v1107_v52 = vpop.permute.xlu0 %1106  ;;  %v1184_v55 = vpop.permute.xlu1 %1183 }
 0x56a   :  { %2129 = vmatmul.mubr.msk.f32.vlgmr.msra.gmra.mrb[8].mxu1 %vm258_vm2, %v606_v45 }
 0x56b   :  { %v2296_v46 = vpop.eup %2295  ;;  %2137 = vmatpush3.msra.mxu1 %v838_v34  ;;  %2138 = vmatprep.mubr.msk.f32.mxu1 %vm2471_vm1, %v2470_v36 }
 0x56c   :  { %v607_v47 = vmul.f32 %v2296_v46, %v2288_v29  ;;  %2146 = vmatprep.subr.mxu1 %v2470_v36 }
 0x56e   :  { %2134 = vmatmul.mubr.msk.f32.vlgmr.msra.gmra.mrb[4].mxu0 %vm258_vm2, %v607_v47 }
 0x56f   :  { %v2298_v49 = vpop.eup %2297  ;;  %2142 = vmatpush3.xpose.msk.msra.mxu0 %vm258_vm2, %v953_v48  ;;  %2143 = vmatprep.mubr.msk.f32.mxu0 %vm2471_vm1, %v2470_v36 }
 0x570   :  { %v608_v50 = vmul.f32 %v2298_v49, %v2290_v31  ;;  %2151 = vmatprep.subr.mxu0 %v2470_v36 }
 0x572   :  { %2139 = vmatmul.mubr.msk.f32.vlgmr.msra.gmra.mrb[10].mxu1 %vm258_vm2, %v608_v50  ;;  %2144 = vmatmul.mubr.msk.f32.vlgmr.msra.gmra.mrb[6].mxu0 %vm258_vm2, %v940_v51 }
 0x573   :  { %2147 = vmatpush3.xpose.msk.msra.mxu1 %vm258_vm2, %v1030_v41  ;;  %2152 = vmatpush3.xpose.msk.msra.mxu0 %vm258_vm2, %v1107_v52 }
 0x574   :  { %2148 = vmatprep.mubr.msk.f32.mxu1 %vm2471_vm1, %v2470_v36  ;;  %2153 = vmatprep.mubr.msk.f32.mxu0 %vm2471_vm1, %v2470_v36 }
 0x575   :  { %2156 = vmatprep.subr.mxu1 %v2470_v36  ;;  %2161 = vmatprep.subr.mxu0 %v2470_v36 }
 0x576   :  { %2149 = vmatmul.mubr.msk.f32.vlgmr.msra.gmra.mrb[12].mxu1 %vm258_vm2, %v941_v53  ;;  %2154 = vmatmul.mubr.msk.f32.vlgmr.msra.gmra.mrb[8].mxu0 %vm258_vm2, %v942_v54 }
 0x577   :  { %2157 = vmatpush3.xpose.msk.msra.mxu1 %vm258_vm2, %v1184_v55  ;;  %2158 = vmatprep.mubr.msk.f32.mxu1 %vm2471_vm1, %v2470_v36 }
 0x578   :  { %2166 = vmatprep.subr.mxu1 %v2470_v36  ;;  %2163 = vmatprep.mubr.msk.f32.mxu0 %vm2471_vm1, %v2470_v36 }
 0x57a   :  { %2159 = vmatmul.mubr.msk.f32.vlgmr.msra.gmra.mrb[14].mxu1 %vm258_vm2, %v943_v56 }
 0x57b   :  { %2168 = vmatprep.mubr.msk.f32.mxu1 %vm2471_vm1, %v2470_v36 }
 0x5d2   :  { %v2747_v57 = vpop.f32.mrb[2].mxu0 }
 0x5d3   :  { %v2125_v58 = vpop.f32.mrb[3].mxu0 }
 0x63d   :  { %v2749_v59 = vpop.f32.mrb[8].mxu1 }
 0x63e   :  { %v2130_v60 = vpop.f32.mrb[9].mxu1 }
 0x641   :  { %v833_v61 = vpop.f32.mrb[4].mxu0 }
 0x642   :  { %v2135_v62 = vpop.f32.mrb[5].mxu0 }
 0x645   :  { %v909_v2 = vpop.f32.mrb[10].mxu1  ;;  %v1025_v3 = vpop.f32.mrb[6].mxu0 }
 0x646   :  { %v1026_v4 = vadd.f32 %v2006_v63, %v1025_v3  ;;  %v2140_v5 = vpop.f32.mrb[11].mxu1  ;;  %v2145_v6 = vpop.f32.mrb[7].mxu0 }
 0x648   :  { %v1260_v7 = vsel %vm258_vm2, %v1026_v4, -inf }
 0x649   :  { %1261 = vmax.xlane.f32.xlu0 %v1260_v7  ;;  %v1102_v8 = vpop.f32.mrb[12].mxu1  ;;  %v1179_v9 = vpop.f32.mrb[8].mxu0 }
 0x64a   :  { %v1103_v10 = vadd.f32 %v2006_v63, %v1102_v8  ;;  %v1180_v13 = vadd.f32 %v2006_v63, %v1179_v9  ;;  %v2150_v14 = vpop.f32.mrb[13].mxu1  ;;  %v2155_v15 = vpop.f32.mrb[9].mxu0 }
 0x64c   :  { %v1266_v16 = vsel %vm258_vm2, %v1180_v13, -inf  ;;  %v1263_v17 = vsel %vm258_vm2, %v1103_v10, -inf }
 0x64d   :  { %1267 = vmax.xlane.f32.xlu0 %v1266_v16  ;;  %1264 = vmax.xlane.f32.xlu1 %v1263_v17  ;;  %v1256_v18 = vpop.f32.mrb[14].mxu1 }
 0x64e   :  { %v1257_v19 = vadd.f32 %v2006_v63, %v1256_v18  ;;  %v2160_v20 = vpop.f32.mrb[15].mxu1 }
 0x650   :  { %v1269_v21 = vsel %vm258_vm2, %v1257_v19, -inf }
 0x651   :  { %1270 = vmax.xlane.f32.xlu0 %v1269_v21 }
 0x65e   :  { %1380 = vrot.lane.b32.xlu1 %v2689_v11, %s2476_s13 }
 0x662   :  { %1456 = vrot.lane.b32.xlu1 %v2697_v25, %s2476_s13 }
 0x6d6   :  { %v1262_v22 = vpop.xlane.xlu0 %1261 }
 0x6d7   :  { %v1272_v23 = vsub.f32 %v1026_v4, %v1262_v22  ;;  %v1626_v4 = vld [vmem:[%s2886_s4 + $0x18] sm:$0xff]  ;;  %v2019_v22 = vld [vmem:[#allocation7] ss:$0 sm:$0xff] }
 0x6d9   :  { %v1276_v24 = vmul.f32 1.442695, %v1272_v23 }
 0x6da   :  { %v1268_v26 = vpop.xlane.xlu0 %1267  ;;  %v1265_v27 = vpop.xlane.xlu1 %1264 }
 0x6db   :  { %2299 = vpow2.f32 %v1276_v24  ;;  %v1274_v28 = vsub.f32 %v1180_v13, %v1268_v26  ;;  %v1273_v29 = vsub.f32 %v1103_v10, %v1265_v27 }
 0x6dd   :  { %v1280_v30 = vmul.f32 1.442695, %v1274_v28  ;;  %v1278_v31 = vmul.f32 1.442695, %v1273_v29 }
 0x6de   :  { %v1381_v32 = vpop.permute.xlu1 %1380  ;;  %v1271_v33 = vpop.xlane.xlu0 %1270 }
 0x6df   :  { %2301 = vpow2.f32 %v1280_v30  ;;  %v1275_v34 = vsub.f32 %v1257_v19, %v1271_v33  ;;  %2167 = vmatpush3.msra.mxu1 %v1381_v32 }
 0x6e0   :  { %2303 = vpow2.f32 %v1278_v31  ;;  %2176 = vmatprep.subr.mxu1 %v2470_v36 }
 0x6e1   :  { %v1282_v11 = vmul.f32 1.442695, %v1275_v34 }
 0x6e2   :  { %v1457_v45 = vpop.permute.xlu1 %1456 }
 0x6e3   :  { %2305 = vpow2.f32 %v1282_v11 }
 0x6e5   :  { %v2300_v25 = vpop.eup %2299 }
 0x6e6   :  { %v1284_v35 = vsel %vm258_vm2, %v2300_v25, 0.0 }
 0x6e7   :  { %1285 = vadd.xlane.f32.xlu0 %v1284_v35 }
 0x6e9   :  { %v2302_v37 = vpop.eup %2301 }
 0x6ea   :  { %v2304_v38 = vpop.eup %2303  ;;  %v1290_v40 = vsel %vm258_vm2, %v2302_v37, 0.0 }
 0x6eb   :  { %v1287_v41 = vsel %vm258_vm2, %v2304_v38, 0.0  ;;  %1291 = vadd.xlane.f32.xlu0 %v1290_v40  ;;  %v1757_v40 = vld [vmem:[%s2889_s7] sm:$0xff] }
 0x6ec   :  { %1288 = vadd.xlane.f32.xlu1 %v1287_v41  ;;  %v1758_v41 = vld [vmem:[%s2889_s7 + $0x8] sm:$0xff] }
 0x6ed   :  { %v2306_v42 = vpop.eup %2305 }
 0x6ee   :  { %v1293_v43 = vsel %vm258_vm2, %v2306_v42, 0.0 }
 0x6f0   :  { %1294 = vadd.xlane.f32.xlu1 %v1293_v43  ;;  %v1759_v43 = vld [vmem:[%s2889_s7 + $0x10] sm:$0xff] }
 0x701   :  { %1532 = vrot.lane.b32.xlu1 %v2691_v12, %s2476_s13  ;;  %1304 = vrot.lane.b32.xlu0 %v2635_v39, %s2476_s13 }
 0x705   :  { %918 = vrot.lane.b32.xlu1 %v833_v61, %s2477_s1  ;;  %914 = vrot.lane.b32.xlu0 %v2749_v59, %s2467_s20 }
 0x709   :  { %922 = vrot.lane.b32.xlu1 %v909_v2, %s2478_s16  ;;  %v1623_v2 = vld [vmem:[%s2886_s4] sm:$0xff] }
 0x774   :  { %v1286_v44 = vpop.xlane.xlu0 %1285 }
 0x775   :  { %2307 = vrcp.f32 %v1286_v44  ;;  %v1760_v44 = vld [vmem:[%s2889_s7 + $0x18] sm:$0xff] }
 0x778   :  { %v1292_v46 = vpop.xlane.xlu0 %1291 }
 0x779   :  { %v1289_v47 = vpop.xlane.xlu1 %1288  ;;  %2309 = vrcp.f32 %v1292_v46 }
 0x77a   :  { %2311 = vrcp.f32 %v1289_v47 }
 0x77c   :  { %v1305_v12 = vpop.permute.xlu0 %1304 }
 0x77d   :  { %v1295_v48 = vpop.xlane.xlu1 %1294  ;;  %2162 = vmatpush3.msra.mxu0 %v1305_v12 }
 0x77e   :  { %2313 = vrcp.f32 %v1295_v48  ;;  %2171 = vmatprep.subr.mxu0 %v2470_v36 }
 0x77f   :  { %v2308_v39 = vpop.eup %2307 }
 0x780   :  { %v1300_v49 = vmul.f32 %v2308_v39, %v2300_v25  ;;  %v915_v55 = vpop.permute.xlu0 %914 }
 0x781   :  { %v1533_v50 = vpop.permute.xlu1 %1532  ;;  %v925_v59 = vsel %vm258_vm2, %v2747_v57, %v915_v55  ;;  %v1624_v57 = vld [vmem:[%s2886_s4 + $0x8] sm:$0xff] }
 0x782   :  { %2164 = vmatmul.mubr.msk.f32.vlgmr.msra.gmra.mrb[10].mxu0 %vm258_vm2, %v1300_v49  ;;  %v2230_v3 = vpack.c.bf16 %v1624_v57, %v1623_v2  ;;  %v1869_v2 = vld [vmem:[%s2891_s9 + $0x10] sm:$0xff]  ;;  %v1870_v57 = vld [vmem:[%s2891_s9 + $0x18] sm:$0xff] }
 0x783   :  { %v2310_v51 = vpop.eup %2309  ;;  %2172 = vmatpush3.msra.mxu0 %v1457_v45  ;;  %2173 = vmatprep.mubr.msk.f32.mxu0 %vm2471_vm1, %v2470_v36  ;;  %v2242_v45 = vpack.c.bf16 %v1760_v44, %v1759_v43 }
 0x784   :  { %v2312_v52 = vpop.eup %2311  ;;  %v1302_v53 = vmul.f32 %v2310_v51, %v2302_v37  ;;  %2231 = vmatprep.subr.bf16.mxu0 %v2230_v3  ;;  %v2022_v51 = vld [vmem:[#allocation8 + $0x2] ss:$0 sm:$0xff] }
 0x785   :  { %v1301_v54 = vmul.f32 %v2312_v52, %v2304_v38  ;;  %v919_v56 = vpop.permute.xlu1 %918 }
 0x786   :  { %2174 = vmatmul.mubr.msk.f32.vlgmr.msra.gmra.mrb[12].mxu0 %vm258_vm2, %v1302_v53  ;;  %v927_v61 = vsel %vm926_vm3, %v925_v59, %v919_v56  ;;  %v2023_v53 = vld [vmem:[#allocation8 + $0x3] ss:$0 sm:$0xff] }
 0x787   :  { %2169 = vmatmul.mubr.msk.f32.vlgmr.msra.gmra.mrb[16].mxu1 %vm258_vm2, %v1301_v54  ;;  %2233 = vmatpush3.bf16.msra.mxu0 %v2230_v3  ;;  %v2250_v3 = vpack.c.bf16 %v1870_v57, %v1869_v2 }
 0x788   :  { %v2314_v58 = vpop.eup %2313  ;;  %2177 = vmatpush3.msra.mxu1 %v1533_v50  ;;  %2178 = vmatprep.mubr.msk.f32.mxu1 %vm2471_vm1, %v2470_v36  ;;  %v1625_v36 = vld [vmem:[%s2886_s4 + $0x10] sm:$0xff]  ;;  %s1973_s4 = sshll.u32 %s2479_s18, 4  ;;  %s1974_s4 = int_to_ptr.vmem [resolvable:$true] %s1973_s4 }
 0x789   :  { %v1303_v60 = vmul.f32 %v2314_v58, %v2306_v42  ;;  %v923_v62 = vpop.permute.xlu1 %922  ;;  %v2234_v5 = vpack.c.bf16 %v1626_v4, %v1625_v36  ;;  %v2238_v42 = vpack.c.bf16 %v1758_v41, %v1757_v40  ;;  %v1871_v36 = vld [vmem:[%s2891_s9 + $0x20] sm:$0xff]  ;;  %v1872_v4 = vld [vmem:[%s2891_s9 + $0x28] sm:$0xff]  ;;  %s2433_s23 = scalar_lea.vmem %s1974_s4, 256  ;;  %p2438_p13 = scmp.lt.s32.totalorder %s1974_s4, %s1974_s4 }
 0x78a   :  { %v929_v63 = vsel %vm928_vm4, %v927_v61, %v923_v62  ;;  %v1867_v61 = vld [vmem:[%s2891_s9] sm:$0xff]  ;;  %v1868_v62 = vld [vmem:[%s2891_s9 + $0x8] sm:$0xff]  ;;  %p2434_p12 = scmp.ne.s32.totalorder %s1974_s4, %s2433_s23  ;;  %p2439_p0 = scmp.lt.s32.totalorder %s2433_s23, %s2433_s23 }
 0x78b   :  { %2179 = vmatmul.mubr.msk.f32.vlgmr.msra.gmra.mrb[18].mxu1 %vm258_vm2, %v1303_v60  ;;  %2189 = vmatprep.mubr.msk.f32.mxu0 %vm103_vm0, %v929_v63  ;;  %v2246_v63 = vpack.c.bf16 %v1868_v62, %v1867_v61 }
 0x78c   :  { %2235 = vmatprep.subr.bf16.mxu0 %v2234_v5  ;;  %2239 = vmatprep.subr.bf16.mxu1 %v2238_v42  ;;  %p2440_p1 = por %p2439_p0, %p2438_p13 }
 0x78d   :  { %2237 = vmatpush3.bf16.msra.mxu0 %v2234_v5  ;;  %2241 = vmatpush3.bf16.msra.mxu1 %v2238_v42  ;;  %v2254_v5 = vpack.c.bf16 %v1872_v4, %v1871_v36 }
 0x78e   :  { %2243 = vmatprep.subr.bf16.mxu1 %v2242_v45  ;;  %2247 = vmatprep.subr.bf16.mxu0 %v2246_v63  ;;  %p2441_p2 = pnand %p2440_p1, %p2434_p12 }
 0x791   :  { %2245 = vmatpush3.bf16.msra.mxu1 %v2242_v45 }
 0x855   :  { %v1376_v6 = vpop.f32.mrb[10].mxu0 }
 0x856   :  { %v2165_v7 = vpop.f32.mrb[11].mxu0 }
 0x857   :  { %v1874_v7 = vld [vmem:[%s2891_s9 + $0x38] sm:$0xff] }
 0x859   :  { %v1528_v8 = vpop.f32.mrb[12].mxu0 }
 0x85a   :  { %v1452_v9 = vpop.f32.mrb[16].mxu1  ;;  %v2175_v10 = vpop.f32.mrb[13].mxu0 }
 0x85b   :  { %1609 = vrot.lane.b32.xlu0 %v1452_v9, %s2467_s20  ;;  %v2170_v13 = vpop.f32.mrb[17].mxu1  ;;  %v2024_v9 = vld [vmem:[#allocation10] ss:$0 sm:$0xff] }
 0x85e   :  { %v1604_v14 = vpop.f32.mrb[18].mxu1 }
 0x85f   :  { %1613 = vrot.lane.b32.xlu0 %v1528_v8, %s2477_s1  ;;  %1617 = vrot.lane.b32.xlu1 %v1604_v14, %s2478_s16  ;;  %v2180_v15 = vpop.f32.mrb[19].mxu1 }
 0x8cd   :  { %v1610_v16 = vpop.permute.xlu0 %1609 }
 0x8ce   :  { %v1620_v17 = vsel %vm258_vm2, %v1376_v6, %v1610_v16  ;;  %v1873_v6 = vld [vmem:[%s2891_s9 + $0x30] sm:$0xff] }
 0x8cf   :  { %v2258_v8 = vpack.c.bf16 %v1874_v7, %v1873_v6 }
 0x8d1   :  { %v1614_v18 = vpop.permute.xlu0 %1613  ;;  %v1618_v19 = vpop.permute.xlu1 %1617 }
 0x8d2   :  { %v1621_v20 = vsel %vm926_vm3, %v1620_v17, %v1614_v18 }
 0x8d3   :  { %v1622_v21 = vsel %vm928_vm4, %v1621_v20, %v1618_v19 }
 0x8d4   :  { %2190 = vmatmul.mubr.msk.f32.vlgmr.msra.gmra.mrb[14].mxu0 %vm103_vm0, %v1622_v21 }
 0x8d5   :  { %2249 = vmatpush3.bf16.msra.mxu0 %v2246_v63 }
 0x8d6   :  { %2251 = vmatprep.subr.bf16.mxu0 %v2250_v3 }
 0x8d9   :  { %2253 = vmatpush3.bf16.msra.mxu0 %v2250_v3 }
 0x8da   :  { %2255 = vmatprep.subr.bf16.mxu0 %v2254_v5 }
 0x8dd   :  { %2257 = vmatpush3.bf16.msra.mxu0 %v2254_v5 }
 0x8de   :  { %2259 = vmatprep.subr.bf16.mxu0 %v2258_v8 }
 0x8e1   :  { %2261 = vmatpush3.bf16.msra.mxu0 %v2258_v8 }
 0x9a7   :  { %v2191_v23 = vpop.f32.mrb[14].mxu0 }
 0x9a8   :  { %v1712_v24 = vadd.f32 %v2191_v23, %v2019_v22  ;;  %v1706_v26 = vpop.f32.mrb[15].mxu0 }
 0x9a9   :  { %v1707_v27 = vadd.f32 %v2019_v22, %v1706_v26 }
 0x9aa   :  { %v2809_v28 = vadd.f32 %v1712_v24, %v2605_v1 }
 0x9ab   :  { %v2812_v29 = vadd.f32 %v1707_v27, %v2603_v0 }
 0x9ac   :  { %v1722_v30 = vsel %vm103_vm0, %v2809_v28, 0.0 }
 0x9ad   :  { %1723 = vadd.xlane.f32.xlu1 %v1722_v30  ;;  %v1719_v31 = vsel %vm103_vm0, %v2812_v29, 0.0 }
 0x9ae   :  { %1720 = vadd.xlane.f32.xlu0 %v1719_v31 }
 0xa3a   :  { %v1724_v32 = vpop.xlane.xlu1 %1723 }
 0xa3b   :  { %v1726_v33 = vmul.f32 0.03125, %v1724_v32  ;;  %v1721_v34 = vpop.xlane.xlu0 %1720 }
 0xa3c   :  { %v1725_v11 = vmul.f32 0.03125, %v1721_v34 }
 0xa3d   :  { %v1728_v25 = vsub.f32 %v2809_v28, %v1726_v33 }
 0xa3e   :  { %v1727_v1 = vsub.f32 %v2812_v29, %v1725_v11 }
 0xa3f   :  { %v1730_v37 = vmul.f32 %v1728_v25, %v1728_v25 }
 0xa40   :  { %v1729_v35 = vmul.f32 %v1727_v1, %v1727_v1 }
 0xa41   :  { %v1734_v38 = vsel %vm103_vm0, %v1730_v37, 0.0 }
 0xa42   :  { %v1731_v0 = vsel %vm103_vm0, %v1729_v35, 0.0 }
 0xa43   :  { %1732 = vadd.xlane.f32.xlu0 %v1731_v0 }
 0xa47   :  { %1735 = vadd.xlane.f32.xlu0 %v1734_v38 }
 0xad0   :  { %v1733_v46 = vpop.xlane.xlu0 %1732 }
 0xad1   :  { %v1737_v47 = vmul.f32 0.03125, %v1733_v46 }
 0xad3   :  { %v1739_v12 = vadd.f32 1e-06, %v1737_v47 }
 0xad4   :  { %v1736_v48 = vpop.xlane.xlu0 %1735 }
 0xad5   :  { %2315 = vrsqrt.f32 %v1739_v12  ;;  %v1738_v39 = vmul.f32 0.03125, %v1736_v48 }
 0xad7   :  { %v1740_v49 = vadd.f32 1e-06, %v1738_v39 }
 0xad9   :  { %2317 = vrsqrt.f32 %v1740_v49 }
 0xadf   :  { %v2316_v50 = vpop.eup %2315 }
 0xae0   :  { %v1743_v52 = vmul.f32 %v2316_v50, %v1727_v1  ;;  %v2027_v1 = vld [vmem:[%s2892_s10] ss:$0 sm:$0xff] }
 0xae2   :  { %v1749_v54 = vmul.f32 %v2022_v51, %v1743_v52 }
 0xae3   :  { %v2318_v55 = vpop.eup %2317 }
 0xae4   :  { %v1744_v56 = vmul.f32 %v2318_v55, %v1728_v25  ;;  %v1755_v58 = vadd.f32 %v2023_v53, %v1749_v54 }
 0xae6   :  { %v1750_v59 = vmul.f32 %v2022_v51, %v1744_v56  ;;  %2200 = vmatprep.mubr.msk.f32.mxu1 %vm103_vm0, %v1755_v58 }
 0xae8   :  { %v1756_v60 = vadd.f32 %v2023_v53, %v1750_v59 }
 0xaea   :  { %2201 = vmatmul.mubr.msk.f32.vlgmr.msra.gmra.mrb[20].mxu1 %vm103_vm0, %v1756_v60 }
 0xbbd   :  { %v2202_v10 = vpop.f32.mrb[20].mxu1 }
 0xbbe   :  { %v1846_v13 = vadd.f32 %v2202_v10, %v2024_v9  ;;  %v1840_v14 = vpop.f32.mrb[21].mxu1 }
 0xbbf   :  { %v1841_v15 = vadd.f32 %v2024_v9, %v1840_v14 }
 0xbc0   :  { %v1852_v16 = vmul.f32 0.044715, %v1846_v13  ;;  %v1850_v34 = vmul.f32 0.5, %v1846_v13 }
 0xbc1   :  { %v1851_v17 = vmul.f32 0.044715, %v1841_v15  ;;  %v1849_v32 = vmul.f32 0.5, %v1841_v15 }
 0xbc2   :  { %v1854_v18 = vmul.f32 %v1852_v16, %v1846_v13 }
 0xbc3   :  { %v1853_v19 = vmul.f32 %v1851_v17, %v1841_v15 }
 0xbc4   :  { %v1856_v20 = vmul.f32 %v1854_v18, %v1846_v13 }
 0xbc5   :  { %v1855_v21 = vmul.f32 %v1853_v19, %v1841_v15 }
 0xbc6   :  { %v1858_v22 = vadd.f32 %v1856_v20, %v1846_v13 }
 0xbc7   :  { %v1857_v23 = vadd.f32 %v1855_v21, %v1841_v15 }
 0xbc8   :  { %v1860_v24 = vmul.f32 0.7978846, %v1858_v22 }
 0xbc9   :  { %v1859_v26 = vmul.f32 0.7978846, %v1857_v23 }
 0xbca   :  { %2319 = vtanh.f32 %v1860_v24 }
 0xbcb   :  { %2321 = vtanh.f32 %v1859_v26 }
 0xbd4   :  { %v2320_v27 = vpop.eup %2319 }
 0xbd5   :  { %v2322_v30 = vpop.eup %2321  ;;  %v1864_v31 = vadd.f32 1.0, %v2320_v27 }
 0xbd6   :  { %v1863_v33 = vadd.f32 1.0, %v2322_v30 }
 0xbd7   :  { %v1866_v25 = vmul.f32 %v1864_v31, %v1850_v34 }
 0xbd8   :  { %v1865_v11 = vmul.f32 %v1863_v33, %v1849_v32 }
 0xbda   :  { %2219 = vmatprep.mubr.msk.f32.mxu0 %vm1882_vm5, %v1865_v11 }
 0xbdb   :  { %2220 = vmatmul.mubr.msk.f32.vlgmr.msra.gmra.mrb[16].mxu0 %vm1882_vm5, %v1866_v25 }
 0xcae   :  { %v2221_v35 = vpop.f32.mrb[16].mxu0 }
 0xcaf   :  { %v1961_v0 = vadd.f32 %v2221_v35, %v2027_v1  ;;  %v1955_v37 = vpop.f32.mrb[17].mxu0 }
 0xcb0   :  { %v1956_v38 = vadd.f32 %v2027_v1, %v1955_v37 }
 0xcb1   :  { %v1965_v40 = vadd.f32 %v1961_v0, %v2809_v28 }
 0xcb2   :  { %v1964_v41 = vadd.f32 %v1956_v38, %v2812_v29 }
 0xcb3   :  { %1967 = vst.msk [vmem:[#allocation11 + $0x8] sm:$0xff] %vm103_vm0, %v1965_v40 }
 0xcb4   :  { %1966 = vst.msk [vmem:[#allocation11] sm:$0xff] %vm103_vm0, %v1964_v41 }
 0xcb5   :  { %2444 = shalt.err (!%p2441_p2)
}
 0xcb6   :  { %s2445_s26 = scalar_lea.hbm %s2893_s11, 256 }
 0xcb7   :  { %p2446_p3 = scmp.ne.s32.totalorder %s2893_s11, %s2445_s26  ;;  %p2449_p4 = scmp.lt.u32.totalorder %s2445_s26, %s2893_s11 }
 0xcb9   :  { %p2451_p5 = pnand %p2449_p4, %p2446_p3 }
 0xcbb   :  { %2454 = shalt.err (!%p2451_p5)
}
 0xcbc   :  { %1979 = dma.vmem_to_hbm [thread:$0]  %s1974_s4, 256, %s2893_s11, [#allocation4], %s2466_s6, %s2466_s6, %s2467_s20  }
 0xcbd   :  { %2461 = dma.done.wait [#allocation4], 256  }
 0xcbe   :  { %2462 = vsyncadd [#allocation4], 4294967040 }
 0xcbf   :  { %1983 = vsyncpa [#allocation3], 1 }
 0xcc0   :  { %1984 = vsyncpa [#allocation6], 1 }
 0xcc1   :  { %1985 = vsyncpa [#allocation9], 1 }
 0xcc2   :  { %1986 = vsyncpa [#allocation4], 1 }

</bundles_post_ra>
